<compile_context>
chip_gen: v7x
topology: tpu7x:2x2x1
jax: 0.10.0
libtpu: 0.0.40
codegen_flags: <defaults>
</compile_context>

<pallas_src>
import functools

import jax
import jax.numpy as jnp
from jax.experimental import pallas as pl
from jax.experimental.pallas import tpu as pltpu


def _round_up(n, m):
    return ((n + m - 1) // m) * m


def _actor_kernel(x_ref, w1_ref, b1_ref, w2_ref, b2_ref, w3_ref, b3_ref,
                  o_ref, *, action_bound):
    # x arrives f32; cast to the MXU compute dtype in-kernel (cheap VPU op,
    # avoids a separate XLA cast dispatch in the wrapper).
    x = x_ref[...].astype(w1_ref.dtype)

    # Layer 1: Linear(state_dim, 400) + ReLU   (bf16 operands, f32 accumulate)
    h1 = jnp.dot(x, w1_ref[...], preferred_element_type=jnp.float32)
    h1 = jnp.maximum(h1 + b1_ref[...], 0.0)

    # Layer 2: Linear(400, 300) + ReLU
    h2 = jnp.dot(h1.astype(w2_ref.dtype), w2_ref[...],
                 preferred_element_type=jnp.float32)
    h2 = jnp.maximum(h2 + b2_ref[...], 0.0)

    # Layer 3: Linear(300, action_dim) + Tanh, scaled by action_bound.
    h3 = jnp.dot(h2.astype(w3_ref.dtype), w3_ref[...],
                 preferred_element_type=jnp.float32)
    # Lane-dense bf16 store (padded action columns are garbage-free zeros of
    # tanh(0)*bound = 0 thanks to zero-padded weights/biases).
    o_ref[...] = (jnp.tanh(h3 + b3_ref[...]) * action_bound).astype(o_ref.dtype)


def init_actor_params(key, state_dim, action_dim):
    """PyTorch-style uniform init (U[-1/sqrt(fan_in), 1/sqrt(fan_in)]), unpadded f32."""
    dims = [(state_dim, 400), (400, 300), (300, action_dim)]
    params = {}
    for i, (fan_in, fan_out) in enumerate(dims, start=1):
        key, kw, kb = jax.random.split(key, 3)
        bound = 1.0 / jnp.sqrt(jnp.float32(fan_in))
        params[f"w{i}"] = jax.random.uniform(
            kw, (fan_in, fan_out), jnp.float32, -bound, bound)
        params[f"b{i}"] = jax.random.uniform(
            kb, (1, fan_out), jnp.float32, -bound, bound)
    return params


def prepare_actor_params(params, compute_dtype=jnp.bfloat16):
    """Pad hidden/action feature dims to multiples of 128 (state dim only to a
    multiple of 8) and cast weights to the MXU compute dtype; biases stay f32.
    Done ONCE, not per forward call. Zero padding keeps the math exact: padded
    h1/h2 columns come out 0 after ReLU, so they contribute nothing downstream,
    and padded action columns produce tanh(0)*bound = 0."""
    def pad2(a, rows, cols):
        return jnp.pad(a, ((0, rows - a.shape[0]), (0, cols - a.shape[1])))

    s, h1 = params["w1"].shape
    _, h2 = params["w2"].shape
    _, a = params["w3"].shape
    sp = _round_up(s, 8)                 # NOT 128: keeps x DMA / layer-1 K small
    h1p, h2p, ap = (_round_up(d, 128) for d in (h1, h2, a))
    return {
        "w1": pad2(params["w1"], sp, h1p).astype(compute_dtype),
        "b1": pad2(params["b1"], 1, h1p).astype(jnp.float32),
        "w2": pad2(params["w2"], h1p, h2p).astype(compute_dtype),
        "b2": pad2(params["b2"], 1, h2p).astype(jnp.float32),
        "w3": pad2(params["w3"], h2p, ap).astype(compute_dtype),
        "b3": pad2(params["b3"], 1, ap).astype(jnp.float32),
    }


def actor_forward(x, prepared, action_dim, action_bound, *, tile_b=2048):
    """Full Actor forward pass.

    x:        [B, state_dim] float32
    prepared: output of prepare_actor_params (padded bf16 weights / f32 biases)
    Returns   [B, action_dim] float32
    """
    B, S = x.shape
    Sp, H1p = prepared["w1"].shape
    H2p = prepared["w2"].shape[1]
    Ap = prepared["w3"].shape[1]

    # --- batch tiling ---------------------------------------------------
    tile_b = _round_up(max(int(tile_b), 128), 128)   # 128-aligned request
    tile_b = min(tile_b, _round_up(B, 128))          # no bigger than padded batch
    if B > 128:
        # guarantee >= 2 grid steps so both v7x TensorCores get work
        tile_b = min(tile_b, _round_up(pl.cdiv(B, 2), 128))
    num_tiles = pl.cdiv(B, tile_b)
    # tighten tile so tiles divide B_pad with minimal last-tile waste
    tile_b = _round_up(pl.cdiv(B, num_tiles), 128)
    B_pad = num_tiles * tile_b

    # Pad batch (and state dim, if it was not already a multiple of 8). x stays
    # f32 here; the bf16 cast happens inside the kernel.
    x_p = x
    if B_pad != B or Sp != S:
        x_p = jnp.pad(x, ((0, B_pad - B), (0, Sp - S)))

    kernel = functools.partial(_actor_kernel, action_bound=float(action_bound))
    const = lambda i: (0, 0)  # weights/biases: same block every step -> resident

    out = pl.pallas_call(
        kernel,
        out_shape=jax.ShapeDtypeStruct((B_pad, Ap), jnp.bfloat16),
        grid=(num_tiles,),
        in_specs=[
            pl.BlockSpec((tile_b, Sp), lambda i: (i, 0)),   # x: pipelined per tile
            pl.BlockSpec((Sp, H1p), const),
            pl.BlockSpec((1, H1p), const),
            pl.BlockSpec((H1p, H2p), const),
            pl.BlockSpec((1, H2p), const),
            pl.BlockSpec((H2p, Ap), const),
            pl.BlockSpec((1, Ap), const),
        ],
        out_specs=pl.BlockSpec((tile_b, Ap), lambda i: (i, 0)),  # lane-dense (Ap=128)
        compiler_params=pltpu.CompilerParams(
            dimension_semantics=("parallel",),     # megacore sharding on v7x
            vmem_limit_bytes=48 * 1024 * 1024,     # < v7x 64 MiB physical
        ),
    )(x_p, prepared["w1"], prepared["b1"], prepared["w2"], prepared["b2"],
      prepared["w3"], prepared["b3"])

    return out[:B, :action_dim].astype(jnp.float32)


def actor_reference(x, params, action_bound):
    h1 = jnp.maximum(x @ params["w1"] + params["b1"], 0.0)
    h2 = jnp.maximum(h1 @ params["w2"] + params["b2"], 0.0)
    return jnp.tanh(h2 @ params["w3"] + params["b3"]) * action_bound


if __name__ == "__main__":
    state_dim = 8
    action_dim = 4
    action_bound = 2.0
    batch = 8

    key = jax.random.PRNGKey(0)
    key, kx = jax.random.split(key)
    x = jax.random.normal(kx, (batch, state_dim), jnp.float32)
    params = init_actor_params(key, state_dim, action_dim)
    prepared = prepare_actor_params(params)   # pad + bf16 cast, done once

    out = actor_forward(x, prepared, action_dim, action_bound)
    out = jax.block_until_ready(out)

    ref = actor_reference(x, params, action_bound)
    assert out.shape == (batch, action_dim)
    # bf16 MXU operands / bf16 output with f32 accumulation -> loosened tolerance.
    assert jnp.allclose(out, ref, atol=5e-2, rtol=5e-2), "mismatch vs reference"

    print("KERNEL_OK")
</pallas_src>

<mosaic_0001>
module attributes {stable_mosaic.version = 11 : i64} {
  func.func @_actor_kernel(%arg0: i32, %arg1: memref<128x8xf32, #tpu.memory_space<vmem>>, %arg2: memref<8x512xbf16, #tpu.memory_space<vmem>>, %arg3: memref<1x512xf32, #tpu.memory_space<vmem>>, %arg4: memref<512x384xbf16, #tpu.memory_space<vmem>>, %arg5: memref<1x384xf32, #tpu.memory_space<vmem>>, %arg6: memref<384x128xbf16, #tpu.memory_space<vmem>>, %arg7: memref<1x128xf32, #tpu.memory_space<vmem>>, %arg8: memref<128x128xbf16, #tpu.memory_space<vmem>>) attributes {dimension_semantics = [#tpu.dimension_semantics<parallel>], iteration_bounds = array<i64: 1>, scalar_prefetch = 0 : i64, scratch_operands = 0 : i64, tpu.core_type = #tpu.core_type<tc>, window_params = [{transform_indices = @transform_0, window_bounds = array<i64: 128, 8>}, {pipeline_mode = #tpu.pipeline_mode<synchronous>, transform_indices = @transform_1, window_bounds = array<i64: 8, 512>}, {pipeline_mode = #tpu.pipeline_mode<synchronous>, transform_indices = @transform_2, window_bounds = array<i64: 1, 512>}, {pipeline_mode = #tpu.pipeline_mode<synchronous>, transform_indices = @transform_3, window_bounds = array<i64: 512, 384>}, {pipeline_mode = #tpu.pipeline_mode<synchronous>, transform_indices = @transform_4, window_bounds = array<i64: 1, 384>}, {pipeline_mode = #tpu.pipeline_mode<synchronous>, transform_indices = @transform_5, window_bounds = array<i64: 384, 128>}, {pipeline_mode = #tpu.pipeline_mode<synchronous>, transform_indices = @transform_6, window_bounds = array<i64: 1, 128>}, {transform_indices = @transform_7, window_bounds = array<i64: 128, 128>}]} {
    %c0 = arith.constant 0 : index
    %c0_0 = arith.constant 0 : index
    %0 = vector.load %arg1[%c0, %c0_0] : memref<128x8xf32, #tpu.memory_space<vmem>>, vector<128x8xf32>
    %1 = arith.truncf %0 : vector<128x8xf32> to vector<128x8xbf16>
    %c0_1 = arith.constant 0 : index
    %c0_2 = arith.constant 0 : index
    %2 = vector.load %arg2[%c0_1, %c0_2] : memref<8x512xbf16, #tpu.memory_space<vmem>>, vector<8x512xbf16>
    %cst = arith.constant dense<0.000000e+00> : vector<128x512xf32>
    %3 = tpu.matmul %1, %2, %cst {dimension_numbers = #tpu.dot_dimension_numbers<[1], [0], [0], [1], [0, 0, 1, 1], [], []>} : vector<128x8xbf16>, vector<8x512xbf16>, vector<128x512xf32> -> vector<128x512xf32>
    %c0_3 = arith.constant 0 : index
    %c0_4 = arith.constant 0 : index
    %4 = vector.load %arg3[%c0_3, %c0_4] : memref<1x512xf32, #tpu.memory_space<vmem>>, vector<1x512xf32>
    %5 = vector.broadcast %4 : vector<1x512xf32> to vector<128x512xf32>
    %6 = arith.addf %3, %5 : vector<128x512xf32>
    %cst_5 = arith.constant 0.000000e+00 : f32
    %7 = vector.broadcast %cst_5 : f32 to vector<128x512xf32>
    %8 = arith.maximumf %6, %7 : vector<128x512xf32>
    %9 = arith.truncf %8 : vector<128x512xf32> to vector<128x512xbf16>
    %c0_6 = arith.constant 0 : index
    %c0_7 = arith.constant 0 : index
    %10 = vector.load %arg4[%c0_6, %c0_7] : memref<512x384xbf16, #tpu.memory_space<vmem>>, vector<512x384xbf16>
    %cst_8 = arith.constant dense<0.000000e+00> : vector<128x384xf32>
    %11 = tpu.matmul %9, %10, %cst_8 {dimension_numbers = #tpu.dot_dimension_numbers<[1], [0], [0], [1], [0, 0, 1, 1], [], []>} : vector<128x512xbf16>, vector<512x384xbf16>, vector<128x384xf32> -> vector<128x384xf32>
    %c0_9 = arith.constant 0 : index
    %c0_10 = arith.constant 0 : index
    %12 = vector.load %arg5[%c0_9, %c0_10] : memref<1x384xf32, #tpu.memory_space<vmem>>, vector<1x384xf32>
    %13 = vector.broadcast %12 : vector<1x384xf32> to vector<128x384xf32>
    %14 = arith.addf %11, %13 : vector<128x384xf32>
    %cst_11 = arith.constant 0.000000e+00 : f32
    %15 = vector.broadcast %cst_11 : f32 to vector<128x384xf32>
    %16 = arith.maximumf %14, %15 : vector<128x384xf32>
    %17 = arith.truncf %16 : vector<128x384xf32> to vector<128x384xbf16>
    %c0_12 = arith.constant 0 : index
    %c0_13 = arith.constant 0 : index
    %18 = vector.load %arg6[%c0_12, %c0_13] : memref<384x128xbf16, #tpu.memory_space<vmem>>, vector<384x128xbf16>
    %cst_14 = arith.constant dense<0.000000e+00> : vector<128x128xf32>
    %19 = tpu.matmul %17, %18, %cst_14 {dimension_numbers = #tpu.dot_dimension_numbers<[1], [0], [0], [1], [0, 0, 1, 1], [], []>} : vector<128x384xbf16>, vector<384x128xbf16>, vector<128x128xf32> -> vector<128x128xf32>
    %c0_15 = arith.constant 0 : index
    %c0_16 = arith.constant 0 : index
    %20 = vector.load %arg7[%c0_15, %c0_16] : memref<1x128xf32, #tpu.memory_space<vmem>>, vector<1x128xf32>
    %21 = vector.broadcast %20 : vector<1x128xf32> to vector<128x128xf32>
    %22 = arith.addf %19, %21 : vector<128x128xf32>
    %23 = math.tanh %22 : vector<128x128xf32>
    %cst_17 = arith.constant 2.000000e+00 : f32
    %24 = vector.broadcast %cst_17 : f32 to vector<128x128xf32>
    %25 = arith.mulf %23, %24 : vector<128x128xf32>
    %26 = arith.truncf %25 : vector<128x128xf32> to vector<128x128xbf16>
    %c0_18 = arith.constant 0 : index
    %c0_19 = arith.constant 0 : index
    %27 = vector.load %arg8[%c0_18, %c0_19] : memref<128x128xbf16, #tpu.memory_space<vmem>>, vector<128x128xbf16>
    tpu.vector_store %arg8[%c0_18, %c0_19], %26 {strides = array<i32>} : memref<128x128xbf16, #tpu.memory_space<vmem>>, vector<128x128xbf16>,
    return
  }
  func.func @transform_0(%arg0: i32) -> (i32, i32) {
    %c0_i32 = arith.constant 0 : i32
    %c0_i32_0 = arith.constant 0 : i32
    return %arg0, %c0_i32 : i32, i32
  }
  func.func @transform_1(%arg0: i32) -> (i32, i32) {
    %c0_i32 = arith.constant 0 : i32
    %c0_i32_0 = arith.constant 0 : i32
    %c0_i32_1 = arith.constant 0 : i32
    return %c0_i32, %c0_i32_0 : i32, i32
  }
  func.func @transform_2(%arg0: i32) -> (i32, i32) {
    %c0_i32 = arith.constant 0 : i32
    %c0_i32_0 = arith.constant 0 : i32
    %c0_i32_1 = arith.constant 0 : i32
    return %c0_i32, %c0_i32_0 : i32, i32
  }
  func.func @transform_3(%arg0: i32) -> (i32, i32) {
    %c0_i32 = arith.constant 0 : i32
    %c0_i32_0 = arith.constant 0 : i32
    %c0_i32_1 = arith.constant 0 : i32
    return %c0_i32, %c0_i32_0 : i32, i32
  }
  func.func @transform_4(%arg0: i32) -> (i32, i32) {
    %c0_i32 = arith.constant 0 : i32
    %c0_i32_0 = arith.constant 0 : i32
    %c0_i32_1 = arith.constant 0 : i32
    return %c0_i32, %c0_i32_0 : i32, i32
  }
  func.func @transform_5(%arg0: i32) -> (i32, i32) {
    %c0_i32 = arith.constant 0 : i32
    %c0_i32_0 = arith.constant 0 : i32
    %c0_i32_1 = arith.constant 0 : i32
    return %c0_i32, %c0_i32_0 : i32, i32
  }
  func.func @transform_6(%arg0: i32) -> (i32, i32) {
    %c0_i32 = arith.constant 0 : i32
    %c0_i32_0 = arith.constant 0 : i32
    %c0_i32_1 = arith.constant 0 : i32
    return %c0_i32, %c0_i32_0 : i32, i32
  }
  func.func @transform_7(%arg0: i32) -> (i32, i32) {
    %c0_i32 = arith.constant 0 : i32
    %c0_i32_0 = arith.constant 0 : i32
    return %arg0, %c0_i32 : i32, i32
  }
}

</mosaic_0001>

<bundles_post_ra>
// kernel: tpu_custom_call.1
= control target key start
LH: loop header
LB: loop body
LE: loop exit
PB: predicated region body
PF: predicated region fallthrough
CT: control target
= control target key end

     0   :  { %12 = vsyncpa [#allocation3], 0  ;;  %s3385_s0 = inlined_call_operand.vmem [shape: f32[128,8], index: 0, kind: input, shape index: {}]   ;;  %s3386_s1 = inlined_call_operand.vmem [shape: bf16[8,512], index: 1, kind: input, shape index: {}]   ;;  %s3387_s2 = inlined_call_operand.vmem [shape: f32[1,512], index: 2, kind: input, shape index: {}]   ;;  %s3388_s3 = inlined_call_operand.hbm [shape: bf16[512,384], index: 3, kind: input, shape index: {}]   ;;  %s3389_s4 = inlined_call_operand.vmem [shape: f32[1,384], index: 4, kind: input, shape index: {}]   ;;  %s3390_s5 = inlined_call_operand.hbm [shape: bf16[384,128], index: 5, kind: input, shape index: {}]   ;;  %s3391_s6 = inlined_call_operand.vmem [shape: f32[1,128], index: 6, kind: input, shape index: {}]   ;;  %s3392_s7 = inlined_call_operand.hbm [shape: bf16[128,128], index: 7, kind: output, shape index: {}]  }
   0x1   :  { %13 = vsyncpa [#allocation6], 0 }
   0x2   :  { %14 = vsyncpa [#allocation4], 0  ;;  %s2940_s24 = smov [#allocation2]   ;;  %s2868_s28 = scalar_lea.hbm %s3388_s3, 12288 }
   0x3   :  { %s26_s25 = sshll.u32 %s2940_s24, 4  ;;  %p2869_p0 = scmp.ne.s32.totalorder %s3388_s3, %s2868_s28  ;;  %s27_s25 = int_to_ptr.vmem [resolvable:$true] %s26_s25 }
   0x4   :  { %p2872_p1 = scmp.lt.u32.totalorder %s2868_s28, %s3388_s3 }
   0x6   :  { %p2874_p2 = pnand %p2872_p1, %p2869_p0 }
   0x8   :  { %2877 = shalt.err (!%p2874_p2)
}
   0x9   :  { %s2878_s10 = scalar_lea.vmem %s27_s25, 12288  ;;  %p2883_p4 = scmp.lt.s32.totalorder %s27_s25, %s27_s25 }
   0xa   :  { %p2879_p3 = scmp.ne.s32.totalorder %s27_s25, %s2878_s10  ;;  %p2884_p5 = scmp.lt.s32.totalorder %s2878_s10, %s2878_s10 }
   0xc   :  { %p2885_p6 = por %p2884_p5, %p2883_p4 }
   0xe   :  { %p2886_p7 = pnand %p2885_p6, %p2879_p3 }
  0x10   :  { %2889 = shalt.err (!%p2886_p7)
}
  0x11   :  { %s2941_s11 = smov 192   ;;  %s2942_s12 = smov 12  }
  0x12   :  { %32 = dma.hbm_to_vmem [thread:$0]  %s3388_s3, 12288, %s27_s25, [#allocation3], %s2941_s11, %s2941_s11, %s2942_s12  }
  0x13   :  { %s2943_s15 = smov [#allocation5]   ;;  %s2890_s19 = scalar_lea.hbm %s3390_s5, 3072 }
  0x14   :  { %s40_s16 = sshll.u32 %s2943_s15, 4  ;;  %p2891_p8 = scmp.ne.s32.totalorder %s3390_s5, %s2890_s19  ;;  %s41_s16 = int_to_ptr.vmem [resolvable:$true] %s40_s16 }
  0x15   :  { %p2894_p9 = scmp.lt.u32.totalorder %s2890_s19, %s3390_s5 }
  0x17   :  { %p2896_p10 = pnand %p2894_p9, %p2891_p8 }
  0x19   :  { %2899 = shalt.err (!%p2896_p10)
}
  0x1a   :  { %s2900_s24 = scalar_lea.vmem %s41_s16, 3072  ;;  %p2905_p12 = scmp.lt.s32.totalorder %s41_s16, %s41_s16 }
  0x1b   :  { %p2901_p11 = scmp.ne.s32.totalorder %s41_s16, %s2900_s24  ;;  %p2906_p13 = scmp.lt.s32.totalorder %s2900_s24, %s2900_s24 }
  0x1d   :  { %p2907_p0 = por %p2906_p13, %p2905_p12 }
  0x1f   :  { %p2908_p1 = pnand %p2907_p0, %p2901_p11 }
  0x21   :  { %2911 = shalt.err (!%p2908_p1)
}
  0x22   :  { %s2944_s3 = smov 64   ;;  %s2945_s25 = smov 4  }
  0x23   :  { %46 = dma.hbm_to_vmem [thread:$0]  %s3390_s5, 3072, %s41_s16, [#allocation6], %s2944_s3, %s2944_s3, %s2945_s25  }
  0x24   :  { %2934 = dma.done.wait [#allocation3], 12288  }
  0x25   :  { %2935 = vsyncadd [#allocation3], 4294955008 }
  0x26   :  { %2936 = dma.done.wait [#allocation6], 3072  }
  0x27   :  { %2937 = vsyncadd [#allocation6], 4294964224  ;;  %v2946_v0 = vmov 0   ;;  %v80_v1 = vld [vmem:[%s3386_s1] sm:$0xff]  ;;  %vm139_vm0 = vcmask 1043456   ;;  %v57_v3 = vld [vmem:[%s3385_s0 + $0x8] sm:$0xff] }
  0x28   :  { %184 = vmatprep.mubr.bf16.mxu0 %v2946_v0  ;;  %297 = vmatprep.mubr.bf16.mxu1 %v2946_v0  ;;  %v56_v2 = vld [vmem:[%s3385_s0] sm:$0xff]  ;;  %v2147_v4 = vcombine.high %v80_v1, %v80_v1  ;;  %v2146_v5 = vcombine.low %v80_v1, %v80_v1  ;;  %vm114_vm1 = vcmask 64512   ;;  %v81_v8 = vld [vmem:[%s3386_s1 + $0x8] sm:$0xff]  ;;  %v58_v9 = vld [vmem:[%s3385_s0 + $0x10] sm:$0xff] }
  0x29   :  { %v72_v7 = vpack.c.bf16 %v57_v3, %v56_v2  ;;  %v59_v10 = vld [vmem:[%s3385_s0 + $0x18] sm:$0xff]  ;;  %v2149_v11 = vcombine.high %v81_v8, %v81_v8  ;;  %v2148_v12 = vcombine.low %v81_v8, %v81_v8  ;;  %v2684_v13 = vld [vmem:[#allocation2] ss:$12 sps:$4 sm:$0xff]   ;;  %v2686_v14 = vld [vmem:[#allocation2 + $0x4] ss:$12 sps:$4 sm:$0xff]  }
  0x2a   :  { %2150 = vmatprep.subr.msk.bf16.mxu0 %vm139_vm0, %v2147_v4  ;;  %v141_v6 = vsel %vm139_vm0, %v2146_v5, 0  ;;  %v2687_v16 = vld [vmem:[#allocation2 + $0xc8] ss:$12 sps:$4 sm:$0xff]   ;;  %v2688_v17 = vld [vmem:[#allocation2 + $0x18] ss:$12 sps:$4 sm:$0xff]   ;;  %v73_v20 = vpack.c.bf16 %v59_v10, %v58_v9 }
  0x2b   :  { %153 = vmatpush1.bf16.msra.mxu0 %v141_v6  ;;  %2159 = vmatprep.subr.msk.bf16.mxu1 %vm139_vm0, %v2149_v11  ;;  %v147_v15 = vsel %vm139_vm0, %v2148_v12, 0  ;;  %v2690_v18 = vld [vmem:[#allocation2 + $0x1c] ss:$12 sps:$4 sm:$0xff]   ;;  %v2694_v21 = vld [vmem:[#allocation2 + $0x34] ss:$12 sps:$4 sm:$0xff]  }
  0x2c   :  { %266 = vmatpush1.bf16.msra.mxu1 %v147_v15  ;;  %1131 = vmatprep.subr.bf16.mxu0 %v2686_v14  ;;  %v2691_v19 = vld [vmem:[#allocation2 + $0x8] ss:$12 sps:$4 sm:$0xff]   ;;  %v2695_v22 = vld [vmem:[#allocation2 + $0xe0] ss:$12 sps:$4 sm:$0xff]   ;;  %v2692_v23 = vld [vmem:[#allocation2 + $0x30] ss:$12 sps:$4 sm:$0xff]  }
  0x2d   :  { %2368 = vmatprep.subr.bf16.mxu1 %v2687_v16  ;;  %v2698_v24 = vld [vmem:[#allocation2 + $0x4c] ss:$12 sps:$4 sm:$0xff]   ;;  %v60_v26 = vld [vmem:[%s3385_s0 + $0x20] sm:$0xff]  ;;  %v2696_v29 = vld [vmem:[#allocation2 + $0x48] ss:$12 sps:$4 sm:$0xff]  }
  0x2e   :  { %2151 = vmatmul.mubr.msk.bf16.vlgmr.msra.gmra.mrb[0].mxu0 %vm114_vm1, %v72_v7  ;;  %v2699_v25 = vld [vmem:[#allocation2 + $0x20] ss:$12 sps:$4 sm:$0xff]   ;;  %v2703_v28 = vld [vmem:[#allocation2 + $0xf8] ss:$12 sps:$4 sm:$0xff]   ;;  %v62_v34 = vld [vmem:[%s3385_s0 + $0x30] sm:$0xff] }
  0x2f   :  { %194 = vmatprep.mubr.bf16.mxu0 %v2946_v0  ;;  %1132 = vmatpush1.bf16.msra.mxu0 %v2684_v13  ;;  %v61_v27 = vld [vmem:[%s3385_s0 + $0x28] sm:$0xff]  ;;  %v2702_v30 = vld [vmem:[#allocation2 + $0x64] ss:$12 sps:$4 sm:$0xff]   ;;  %v63_v36 = vld [vmem:[%s3385_s0 + $0x38] sm:$0xff] }
  0x30   :  { %1133 = vmatprep.subr.bf16.mxu0 %v2690_v18  ;;  %2160 = vmatmul.mubr.msk.bf16.vlgmr.msra.gmra.mrb[0].mxu1 %vm114_vm1, %v72_v7  ;;  %v74_v31 = vpack.c.bf16 %v61_v27, %v60_v26  ;;  %v2707_v32 = vld [vmem:[#allocation2 + $0x38] ss:$12 sps:$4 sm:$0xff]   ;;  %v2700_v33 = vld [vmem:[#allocation2 + $0x60] ss:$12 sps:$4 sm:$0xff]   ;;  %v2711_v35 = vld [vmem:[#allocation2 + $0x110] ss:$12 sps:$4 sm:$0xff]   ;;  %v75_v41 = vpack.c.bf16 %v63_v36, %v62_v34 }
  0x31   :  { %307 = vmatprep.mubr.bf16.mxu1 %v2946_v0  ;;  %2369 = vmatpush3.bf16.msra.mxu1 %v2691_v19  ;;  %v2706_v37 = vld [vmem:[#allocation2 + $0x7c] ss:$12 sps:$4 sm:$0xff]   ;;  %v2704_v39 = vld [vmem:[#allocation2 + $0x78] ss:$12 sps:$4 sm:$0xff]   ;;  %v2710_v42 = vld [vmem:[#allocation2 + $0x94] ss:$12 sps:$4 sm:$0xff]   ;;  %v84_v19 = vlaneseq }
  0x32   :  { %2370 = vmatprep.subr.bf16.mxu1 %v2695_v22  ;;  %v2715_v38 = vld [vmem:[#allocation2 + $0x50] ss:$12 sps:$4 sm:$0xff]   ;;  %v2719_v40 = vld [vmem:[#allocation2 + $0x128] ss:$12 sps:$4 sm:$0xff]   ;;  %v2714_v45 = vld [vmem:[#allocation2 + $0xac] ss:$12 sps:$4 sm:$0xff]  }
  0x33   :  { %1134 = vmatpush1.bf16.msra.mxu0 %v2688_v17  ;;  %v2723_v43 = vld [vmem:[#allocation2 + $0x68] ss:$12 sps:$4 sm:$0xff]   ;;  %v2708_v44 = vld [vmem:[#allocation2 + $0x90] ss:$12 sps:$4 sm:$0xff]   ;;  %v2727_v46 = vld [vmem:[#allocation2 + $0x140] ss:$12 sps:$4 sm:$0xff]  }
  0x34   :  { %1135 = vmatprep.subr.bf16.mxu0 %v2694_v21  ;;  %v64_v47 = vld [vmem:[%s3385_s0 + $0x40] sm:$0xff]  ;;  %v65_v48 = vld [vmem:[%s3385_s0 + $0x48] sm:$0xff]  ;;  %v66_v55 = vld [vmem:[%s3385_s0 + $0x50] sm:$0xff] }
  0x35   :  { %2371 = vmatpush3.bf16.msra.mxu1 %v2699_v25  ;;  %v2731_v49 = vld [vmem:[#allocation2 + $0x80] ss:$12 sps:$4 sm:$0xff]   ;;  %v2712_v50 = vld [vmem:[#allocation2 + $0xa8] ss:$12 sps:$4 sm:$0xff]   ;;  %v76_v51 = vpack.c.bf16 %v65_v48, %v64_v47  ;;  %v2718_v52 = vld [vmem:[#allocation2 + $0xc4] ss:$12 sps:$4 sm:$0xff]  }
  0x36   :  { %2152 = vmatmul.mubr.msk.bf16.gmra.mrb[4].mxu0 %vm114_vm1, %v73_v20  ;;  %2372 = vmatprep.subr.bf16.mxu1 %v2703_v28  ;;  %v2735_v53 = vld [vmem:[#allocation2 + $0x158] ss:$12 sps:$4 sm:$0xff]   ;;  %v2716_v54 = vld [vmem:[#allocation2 + $0xc0] ss:$12 sps:$4 sm:$0xff]   ;;  %v2722_v57 = vld [vmem:[#allocation2 + $0xdc] ss:$12 sps:$4 sm:$0xff]  }
  0x37   :  { %204 = vmatprep.mubr.bf16.mxu0 %v2946_v0  ;;  %1136 = vmatpush1.bf16.msra.mxu0 %v2692_v23  ;;  %v67_v56 = vld [vmem:[%s3385_s0 + $0x58] sm:$0xff]  ;;  %v2726_v60 = vld [vmem:[#allocation2 + $0xf4] ss:$12 sps:$4 sm:$0xff]   ;;  %v69_v2 = vld [vmem:[%s3385_s0 + $0x68] sm:$0xff] }
  0x38   :  { %1137 = vmatprep.subr.bf16.mxu0 %v2698_v24  ;;  %2161 = vmatmul.mubr.msk.bf16.gmra.mrb[4].mxu1 %vm114_vm1, %v73_v20  ;;  %v2739_v58 = vld [vmem:[#allocation2 + $0x98] ss:$12 sps:$4 sm:$0xff]   ;;  %v77_v61 = vpack.c.bf16 %v67_v56, %v66_v55  ;;  %v2724_v62 = vld [vmem:[#allocation2 + $0xf0] ss:$12 sps:$4 sm:$0xff]   ;;  %v2728_v3 = vld [vmem:[#allocation2 + $0x108] ss:$12 sps:$4 sm:$0xff]  }
  0x39   :  { %317 = vmatprep.mubr.bf16.mxu1 %v2946_v0  ;;  %2373 = vmatpush3.bf16.msra.mxu1 %v2707_v32  ;;  %v2720_v59 = vld [vmem:[#allocation2 + $0xd8] ss:$12 sps:$4 sm:$0xff]   ;;  %v2732_v6 = vld [vmem:[#allocation2 + $0x120] ss:$12 sps:$4 sm:$0xff]   ;;  %v2738_v7 = vld [vmem:[#allocation2 + $0x13c] ss:$12 sps:$4 sm:$0xff]  }
  0x3a   :  { %2374 = vmatprep.subr.bf16.mxu1 %v2711_v35  ;;  %v2730_v63 = vld [vmem:[#allocation2 + $0x10c] ss:$12 sps:$4 sm:$0xff]   ;;  %v68_v1 = vld [vmem:[%s3385_s0 + $0x60] sm:$0xff]  ;;  %v70_v8 = vld [vmem:[%s3385_s0 + $0x70] sm:$0xff]  ;;  %v3105_v20 = vshrl.u32 %v84_v19, 7 }
  0x3b   :  { %1138 = vmatpush1.bf16.msra.mxu0 %v2696_v29  ;;  %v2734_v4 = vld [vmem:[#allocation2 + $0x124] ss:$12 sps:$4 sm:$0xff]   ;;  %v78_v5 = vpack.c.bf16 %v69_v2, %v68_v1  ;;  %v71_v9 = vld [vmem:[%s3385_s0 + $0x78] sm:$0xff]  ;;  %v2742_v12 = vld [vmem:[#allocation2 + $0x154] ss:$12 sps:$4 sm:$0xff]  }
  0x3c   :  { %1139 = vmatprep.subr.bf16.mxu0 %v2702_v30  ;;  %v2736_v10 = vld [vmem:[#allocation2 + $0x138] ss:$12 sps:$4 sm:$0xff]   ;;  %v79_v11 = vpack.c.bf16 %v71_v9, %v70_v8  ;;  %v2740_v13 = vld [vmem:[#allocation2 + $0x150] ss:$12 sps:$4 sm:$0xff]   ;;  %v2744_v16 = vld [vmem:[#allocation2 + $0x168] ss:$12 sps:$4 sm:$0xff]  }
  0x3d   :  { %2375 = vmatpush3.bf16.msra.mxu1 %v2715_v38  ;;  %v2743_v14 = vld [vmem:[#allocation2 + $0x170] ss:$12 sps:$4 sm:$0xff]   ;;  %v2746_v15 = vld [vmem:[#allocation2 + $0x16c] ss:$12 sps:$4 sm:$0xff]   ;;  %v86_v21 = vsub.s32 0, %v3105_v20  ;;  %v90_v23 = vsub.s32 1, %v3105_v20 }
  0x3e   :  { %2153 = vmatmul.mubr.msk.bf16.gmra.mrb[8].mxu0 %vm114_vm1, %v74_v31  ;;  %2376 = vmatprep.subr.bf16.mxu1 %v2719_v40  ;;  %v2747_v17 = vld [vmem:[#allocation2 + $0xb0] ss:$12 sps:$4 sm:$0xff]   ;;  %v82_v22 = vld [vmem:[%s3387_s2] sm:$0xf]  ;;  %v94_v26 = vsub.s32 2, %v3105_v20  ;;  %v98_v27 = vsub.s32 3, %v3105_v20 }
  0x3f   :  { %214 = vmatprep.mubr.bf16.mxu0 %v2946_v0  ;;  %1140 = vmatpush1.bf16.msra.mxu0 %v2700_v33  ;;  %v2750_v18 = vld [vmem:[#allocation2 + $0x184] ss:$12 sps:$4 sm:$0xff]   ;;  %v3114_v24 = vrot.slane %v82_v22, %v86_v21  ;;  %v3118_v25 = vrot.slane %v82_v22, %v90_v23 }
  0x40   :  { %1141 = vmatprep.subr.bf16.mxu0 %v2706_v37  ;;  %2162 = vmatmul.mubr.msk.bf16.gmra.mrb[8].mxu1 %vm114_vm1, %v74_v31  ;;  %v3126_v33 = vrot.slane %v82_v22, %v94_v26  ;;  %v3129_v36 = vrot.slane %v82_v22, %v98_v27 }
  0x41   :  { %327 = vmatprep.mubr.bf16.mxu1 %v2946_v0  ;;  %2377 = vmatpush3.bf16.msra.mxu1 %v2723_v43 }
  0x42   :  { %2378 = vmatprep.subr.bf16.mxu1 %v2727_v46  ;;  %v2748_v46 = vld [vmem:[#allocation2 + $0x180] ss:$12 sps:$4 sm:$0xff]  }
  0x43   :  { %1142 = vmatpush1.bf16.msra.mxu0 %v2704_v39 }
  0x44   :  { %1143 = vmatprep.subr.bf16.mxu0 %v2710_v42 }
  0x45   :  { %2379 = vmatpush3.bf16.msra.mxu1 %v2731_v49 }
  0x46   :  { %2154 = vmatmul.mubr.msk.bf16.gmra.mrb[12].mxu0 %vm114_vm1, %v75_v41  ;;  %2380 = vmatprep.subr.bf16.mxu1 %v2735_v53 }
  0x47   :  { %224 = vmatprep.mubr.bf16.mxu0 %v2946_v0  ;;  %1144 = vmatpush1.bf16.msra.mxu0 %v2708_v44 }
  0x48   :  { %1145 = vmatprep.subr.bf16.mxu0 %v2714_v45  ;;  %2163 = vmatmul.mubr.msk.bf16.gmra.mrb[12].mxu1 %vm114_vm1, %v75_v41 }
  0x49   :  { %337 = vmatprep.mubr.bf16.mxu1 %v2946_v0  ;;  %2381 = vmatpush3.bf16.msra.mxu1 %v2739_v58  ;;  %v2759_v58 = vld [vmem:[#allocation2 + $0x260] ss:$12 sps:$4 sm:$0xff]  }
  0x4a   :  { %2382 = vmatprep.subr.bf16.mxu1 %v2743_v14 }
  0x4b   :  { %1146 = vmatpush1.bf16.msra.mxu0 %v2712_v50 }
  0x4c   :  { %1147 = vmatprep.subr.bf16.mxu0 %v2718_v52 }
  0x4d   :  { %2383 = vmatpush3.bf16.msra.mxu1 %v2747_v17 }
  0x4e   :  { %2155 = vmatmul.mubr.msk.bf16.gmra.mrb[16].mxu0 %vm114_vm1, %v76_v51 }
  0x4f   :  { %234 = vmatprep.mubr.bf16.mxu0 %v2946_v0  ;;  %1148 = vmatpush1.bf16.msra.mxu0 %v2716_v54 }
  0x50   :  { %1149 = vmatprep.subr.bf16.mxu0 %v2722_v57  ;;  %2164 = vmatmul.mubr.msk.bf16.gmra.mrb[16].mxu1 %vm114_vm1, %v76_v51  ;;  %v2755_v51 = vld [vmem:[#allocation2 + $0x188] ss:$12 sps:$4 sm:$0xff]  }
  0x51   :  { %347 = vmatprep.mubr.bf16.mxu1 %v2946_v0  ;;  %v2754_v57 = vld [vmem:[#allocation2 + $0x19c] ss:$12 sps:$4 sm:$0xff]  }
  0x53   :  { %1150 = vmatpush1.bf16.msra.mxu0 %v2720_v59 }
  0x54   :  { %1151 = vmatprep.subr.bf16.mxu0 %v2726_v60 }
  0x56   :  { %2156 = vmatmul.mubr.msk.bf16.gmra.mrb[20].mxu0 %vm114_vm1, %v77_v61 }
  0x57   :  { %244 = vmatprep.mubr.bf16.mxu0 %v2946_v0  ;;  %1152 = vmatpush1.bf16.msra.mxu0 %v2724_v62 }
  0x58   :  { %1153 = vmatprep.subr.bf16.mxu0 %v2730_v63  ;;  %2165 = vmatmul.mubr.msk.bf16.gmra.mrb[20].mxu1 %vm114_vm1, %v77_v61 }
  0x59   :  { %357 = vmatprep.mubr.bf16.mxu1 %v2946_v0 }
  0x5b   :  { %1154 = vmatpush1.bf16.msra.mxu0 %v2728_v3 }
  0x5c   :  { %1155 = vmatprep.subr.bf16.mxu0 %v2734_v4 }
  0x5e   :  { %2157 = vmatmul.mubr.msk.bf16.gmra.mrb[24].mxu0 %vm114_vm1, %v78_v5 }
  0x5f   :  { %254 = vmatprep.mubr.bf16.mxu0 %v2946_v0  ;;  %1156 = vmatpush1.bf16.msra.mxu0 %v2732_v6  ;;  %v2758_v6 = vld [vmem:[#allocation2 + $0x1b4] ss:$12 sps:$4 sm:$0xff]  }
  0x60   :  { %1157 = vmatprep.subr.bf16.mxu0 %v2738_v7  ;;  %2166 = vmatmul.mubr.msk.bf16.gmra.mrb[24].mxu1 %vm114_vm1, %v78_v5  ;;  %v2752_v5 = vld [vmem:[#allocation2 + $0x198] ss:$12 sps:$4 sm:$0xff]   ;;  %v2763_v7 = vld [vmem:[#allocation2 + $0x1a0] ss:$12 sps:$4 sm:$0xff]  }
  0x61   :  { %367 = vmatprep.mubr.bf16.mxu1 %v2946_v0  ;;  %v2751_v0 = vld [vmem:[#allocation2 + $0x248] ss:$12 sps:$4 sm:$0xff]  }
  0x62   :  { %2432 = vmatprep.subr.bf16.mxu1 %v2751_v0  ;;  %v2756_v0 = vld [vmem:[#allocation2 + $0x1b0] ss:$12 sps:$4 sm:$0xff]  }
  0x63   :  { %1158 = vmatpush1.bf16.msra.mxu0 %v2736_v10 }
  0x64   :  { %1159 = vmatprep.subr.bf16.mxu0 %v2742_v12 }
  0x66   :  { %2158 = vmatmul.mubr.msk.bf16.gmra.mrb[28].mxu0 %vm114_vm1, %v79_v11 }
  0x67   :  { %1160 = vmatpush1.bf16.msra.mxu0 %v2740_v13 }
  0x68   :  { %2167 = vmatmul.mubr.msk.bf16.gmra.mrb[28].mxu1 %vm114_vm1, %v79_v11  ;;  %1161 = vmatprep.subr.bf16.mxu0 %v2746_v15  ;;  %v2767_v11 = vld [vmem:[#allocation2 + $0x278] ss:$12 sps:$4 sm:$0xff]  }
  0x6b   :  { %1162 = vmatpush1.bf16.msra.mxu0 %v2744_v16 }
  0x6c   :  { %1244 = vmatprep.subr.bf16.mxu0 %v2750_v18 }
 0x101   :  { %v186_v28 = vpop.f32.mrb[0].mxu0 }
 0x102   :  { %v187_v29 = vadd.f32 %v186_v28, %v3114_v24  ;;  %v188_v30 = vpop.f32.mrb[1].mxu0 }
 0x103   :  { %v189_v31 = vadd.f32 %v188_v30, %v3118_v25  ;;  %v190_v32 = vpop.f32.mrb[2].mxu0  ;;  %v299_v40 = vpop.f32.mrb[0].mxu1 }
 0x104   :  { %v191_v34 = vadd.f32 %v190_v32, %v3114_v24  ;;  %v192_v35 = vpop.f32.mrb[3].mxu0  ;;  %v378_v38 = vmax.f32 %v187_v29, 0.0  ;;  %v300_v43 = vadd.f32 %v299_v40, %v3126_v33  ;;  %v301_v44 = vpop.f32.mrb[1].mxu1  ;;  %v2771_v29 = vld [vmem:[#allocation2 + $0x1b8] ss:$12 sps:$4 sm:$0xff]  }
 0x105   :  { %v193_v37 = vadd.f32 %v192_v35, %v3118_v25  ;;  %v379_v41 = vmax.f32 %v189_v31, 0.0  ;;  %v302_v47 = vadd.f32 %v301_v44, %v3129_v36  ;;  %v303_v48 = vpop.f32.mrb[2].mxu1 }
 0x106   :  { %v382_v39 = vmax.f32 %v191_v34, 0.0  ;;  %v380_v52 = vmax.f32 %v300_v43, 0.0  ;;  %v304_v53 = vadd.f32 %v303_v48, %v3126_v33  ;;  %v305_v54 = vpop.f32.mrb[3].mxu1  ;;  %v2760_v48 = vld [vmem:[#allocation2 + $0x1c8] ss:$12 sps:$4 sm:$0xff]  }
 0x107   :  { %v383_v42 = vmax.f32 %v193_v37, 0.0  ;;  %v381_v59 = vmax.f32 %v302_v47, 0.0  ;;  %v306_v60 = vadd.f32 %v305_v54, %v3129_v36  ;;  %v2762_v37 = vld [vmem:[#allocation2 + $0x1cc] ss:$12 sps:$4 sm:$0xff]   ;;  %v2783_v54 = vld [vmem:[#allocation2 + $0x2a8] ss:$12 sps:$4 sm:$0xff]  }
 0x108   :  { %v442_v45 = vpack.c.bf16 %v382_v39, %v378_v38  ;;  %v384_v63 = vmax.f32 %v304_v53, 0.0  ;;  %v2775_v38 = vld [vmem:[#allocation2 + $0x290] ss:$12 sps:$4 sm:$0xff]  }
 0x109   :  { %v443_v49 = vpack.c.bf16 %v383_v42, %v379_v41  ;;  %v196_v50 = vpop.f32.mrb[4].mxu0  ;;  %v385_v3 = vmax.f32 %v306_v60, 0.0 }
 0x10a   :  { %v197_v55 = vadd.f32 %v196_v50, %v3114_v24  ;;  %v198_v56 = vpop.f32.mrb[5].mxu0  ;;  %v3140_v8 = vpack.c.bf16 %v384_v63, %v380_v52  ;;  %v2779_v50 = vld [vmem:[#allocation2 + $0x1d0] ss:$12 sps:$4 sm:$0xff]  }
 0x10b   :  { %v199_v61 = vadd.f32 %v198_v56, %v3118_v25  ;;  %v200_v62 = vpop.f32.mrb[6].mxu0  ;;  %1163 = vmatprep.mubr.bf16.mxu0 %v443_v49  ;;  %1389 = vmatprep.mubr.bf16.mxu1 %v443_v49  ;;  %v3142_v12 = vpack.c.bf16 %v385_v3, %v381_v59  ;;  %v309_v13 = vpop.f32.mrb[4].mxu1  ;;  %v2766_v49 = vld [vmem:[#allocation2 + $0x1e4] ss:$12 sps:$4 sm:$0xff]  }
 0x10c   :  { %v201_v1 = vadd.f32 %v200_v62, %v3114_v24  ;;  %v202_v2 = vpop.f32.mrb[7].mxu0  ;;  %1164 = vmatmul.mubr.bf16.vlgmr.msra.gmra.mrb[32].mxu0 %v442_v45  ;;  %1390 = vmatmul.mubr.bf16.vlgmr.msra.gmra.mrb[32].mxu1 %v442_v45  ;;  %v386_v9 = vmax.f32 %v197_v55, 0.0  ;;  %v310_v16 = vadd.f32 %v309_v13, %v3126_v33  ;;  %v311_v17 = vpop.f32.mrb[5].mxu1  ;;  %v2764_v62 = vld [vmem:[#allocation2 + $0x1e0] ss:$12 sps:$4 sm:$0xff]  }
 0x10d   :  { %v203_v4 = vadd.f32 %v202_v2, %v3118_v25  ;;  %1245 = vmatpush1.bf16.msra.mxu0 %v2748_v46  ;;  %2433 = vmatpush3.bf16.msra.mxu1 %v2755_v51  ;;  %v387_v14 = vmax.f32 %v199_v61, 0.0  ;;  %v312_v19 = vadd.f32 %v311_v17, %v3129_v36  ;;  %v313_v22 = vpop.f32.mrb[6].mxu1  ;;  %v2791_v13 = vld [vmem:[#allocation2 + $0x2c0] ss:$12 sps:$4 sm:$0xff]  }
 0x10e   :  { %v390_v10 = vmax.f32 %v201_v1, 0.0  ;;  %1246 = vmatprep.subr.bf16.mxu0 %v2754_v57  ;;  %2434 = vmatprep.subr.bf16.mxu1 %v2759_v58  ;;  %v388_v30 = vmax.f32 %v310_v16, 0.0  ;;  %v314_v31 = vadd.f32 %v313_v22, %v3126_v33  ;;  %v315_v32 = vpop.f32.mrb[7].mxu1 }
 0x10f   :  { %v391_v15 = vmax.f32 %v203_v4, 0.0  ;;  %v389_v39 = vmax.f32 %v312_v19, 0.0  ;;  %v316_v40 = vadd.f32 %v315_v32, %v3129_v36  ;;  %v2787_v4 = vld [vmem:[#allocation2 + $0x1e8] ss:$12 sps:$4 sm:$0xff]  }
 0x110   :  { %v446_v18 = vpack.c.bf16 %v390_v10, %v386_v9  ;;  %v392_v43 = vmax.f32 %v314_v31, 0.0 }
 0x111   :  { %v447_v27 = vpack.c.bf16 %v391_v15, %v387_v14  ;;  %1247 = vmatpush1.bf16.msra.mxu0 %v2752_v5  ;;  %v206_v28 = vpop.f32.mrb[8].mxu0  ;;  %2435 = vmatpush3.bf16.msra.mxu1 %v2763_v7  ;;  %v393_v46 = vmax.f32 %v316_v40, 0.0 }
 0x112   :  { %v207_v34 = vadd.f32 %v206_v28, %v3114_v24  ;;  %v208_v35 = vpop.f32.mrb[9].mxu0  ;;  %1248 = vmatprep.subr.bf16.mxu0 %v2758_v6  ;;  %2436 = vmatprep.subr.bf16.mxu1 %v2767_v11  ;;  %v3152_v51 = vpack.c.bf16 %v392_v43, %v388_v30  ;;  %v2770_v11 = vld [vmem:[#allocation2 + $0x1fc] ss:$12 sps:$4 sm:$0xff]   ;;  %v2768_v28 = vld [vmem:[#allocation2 + $0x1f8] ss:$12 sps:$4 sm:$0xff]  }
 0x113   :  { %v209_v41 = vadd.f32 %v208_v35, %v3118_v25  ;;  %v210_v42 = vpop.f32.mrb[10].mxu0  ;;  %1173 = vmatprep.mubr.bf16.mxu0 %v447_v27  ;;  %1397 = vmatprep.mubr.bf16.mxu1 %v447_v27  ;;  %v3154_v55 = vpack.c.bf16 %v393_v46, %v389_v39  ;;  %v319_v56 = vpop.f32.mrb[8].mxu1  ;;  %v2795_v30 = vld [vmem:[#allocation2 + $0x200] ss:$12 sps:$4 sm:$0xff]   ;;  %v2799_v35 = vld [vmem:[#allocation2 + $0x2d8] ss:$12 sps:$4 sm:$0xff]  }
 0x114   :  { %v211_v44 = vadd.f32 %v210_v42, %v3114_v24  ;;  %v212_v45 = vpop.f32.mrb[11].mxu0  ;;  %1174 = vmatmul.mubr.bf16.gmra.mrb[36].mxu0 %v446_v18  ;;  %1398 = vmatmul.mubr.bf16.gmra.mrb[36].mxu1 %v446_v18  ;;  %v394_v52 = vmax.f32 %v207_v34, 0.0  ;;  %v320_v59 = vadd.f32 %v319_v56, %v3126_v33  ;;  %v321_v60 = vpop.f32.mrb[9].mxu1 }
 0x115   :  { %v213_v47 = vadd.f32 %v212_v45, %v3118_v25  ;;  %1249 = vmatpush1.bf16.msra.mxu0 %v2756_v0  ;;  %2437 = vmatpush3.bf16.msra.mxu1 %v2771_v29  ;;  %v395_v57 = vmax.f32 %v209_v41, 0.0  ;;  %v322_v63 = vadd.f32 %v321_v60, %v3129_v36  ;;  %v323_v1 = vpop.f32.mrb[10].mxu1  ;;  %v2774_v29 = vld [vmem:[#allocation2 + $0x214] ss:$12 sps:$4 sm:$0xff]  }
 0x116   :  { %v398_v53 = vmax.f32 %v211_v44, 0.0  ;;  %1250 = vmatprep.subr.bf16.mxu0 %v2762_v37  ;;  %2438 = vmatprep.subr.bf16.mxu1 %v2775_v38  ;;  %v396_v5 = vmax.f32 %v320_v59, 0.0  ;;  %v324_v6 = vadd.f32 %v323_v1, %v3126_v33  ;;  %v325_v7 = vpop.f32.mrb[11].mxu1  ;;  %v2772_v44 = vld [vmem:[#allocation2 + $0x210] ss:$12 sps:$4 sm:$0xff]  }
 0x117   :  { %v399_v58 = vmax.f32 %v213_v47, 0.0  ;;  %v397_v14 = vmax.f32 %v322_v63, 0.0  ;;  %v326_v15 = vadd.f32 %v325_v7, %v3129_v36 }
 0x118   :  { %v450_v61 = vpack.c.bf16 %v398_v53, %v394_v52  ;;  %v400_v18 = vmax.f32 %v324_v6, 0.0  ;;  %v2811_v6 = vld [vmem:[#allocation2 + $0x230] ss:$12 sps:$4 sm:$0xff]  }
 0x119   :  { %v451_v2 = vpack.c.bf16 %v399_v58, %v395_v57  ;;  %1251 = vmatpush1.bf16.msra.mxu0 %v2760_v48  ;;  %v216_v3 = vpop.f32.mrb[12].mxu0  ;;  %2439 = vmatpush3.bf16.msra.mxu1 %v2779_v50  ;;  %v401_v22 = vmax.f32 %v326_v15, 0.0  ;;  %v2778_v57 = vld [vmem:[#allocation2 + $0x22c] ss:$12 sps:$4 sm:$0xff]   ;;  %v2807_v58 = vld [vmem:[#allocation2 + $0x2f0] ss:$12 sps:$4 sm:$0xff]  }
 0x11a   :  { %v217_v9 = vadd.f32 %v216_v3, %v3114_v24  ;;  %v218_v10 = vpop.f32.mrb[13].mxu0  ;;  %1252 = vmatprep.subr.bf16.mxu0 %v2766_v49  ;;  %2440 = vmatprep.subr.bf16.mxu1 %v2783_v54  ;;  %v3164_v31 = vpack.c.bf16 %v400_v18, %v396_v5  ;;  %v2803_v49 = vld [vmem:[#allocation2 + $0x218] ss:$12 sps:$4 sm:$0xff]   ;;  %v2776_v5 = vld [vmem:[#allocation2 + $0x228] ss:$12 sps:$4 sm:$0xff]  }
 0x11b   :  { %v219_v16 = vadd.f32 %v218_v10, %v3118_v25  ;;  %v220_v17 = vpop.f32.mrb[14].mxu0  ;;  %1183 = vmatprep.mubr.bf16.mxu0 %v451_v2  ;;  %1405 = vmatprep.mubr.bf16.mxu1 %v451_v2  ;;  %v3166_v37 = vpack.c.bf16 %v401_v22, %v397_v14  ;;  %v329_v38 = vpop.f32.mrb[12].mxu1 }
 0x11c   :  { %v221_v0 = vadd.f32 %v220_v17, %v3114_v24  ;;  %v222_v19 = vpop.f32.mrb[15].mxu0  ;;  %1184 = vmatmul.mubr.bf16.gmra.mrb[40].mxu0 %v450_v61  ;;  %1406 = vmatmul.mubr.bf16.gmra.mrb[40].mxu1 %v450_v61  ;;  %v402_v32 = vmax.f32 %v217_v9, 0.0  ;;  %v330_v41 = vadd.f32 %v329_v38, %v3126_v33  ;;  %v331_v42 = vpop.f32.mrb[13].mxu1 }
 0x11d   :  { %v223_v27 = vadd.f32 %v222_v19, %v3118_v25  ;;  %1253 = vmatpush1.bf16.msra.mxu0 %v2764_v62  ;;  %2441 = vmatpush3.bf16.msra.mxu1 %v2787_v4  ;;  %v403_v39 = vmax.f32 %v219_v16, 0.0  ;;  %v332_v45 = vadd.f32 %v331_v42, %v3129_v36  ;;  %v333_v46 = vpop.f32.mrb[14].mxu1 }
 0x11e   :  { %v406_v34 = vmax.f32 %v221_v0, 0.0  ;;  %1254 = vmatprep.subr.bf16.mxu0 %v2770_v11  ;;  %2442 = vmatprep.subr.bf16.mxu1 %v2791_v13  ;;  %v404_v50 = vmax.f32 %v330_v41, 0.0  ;;  %v334_v52 = vadd.f32 %v333_v46, %v3126_v33  ;;  %v335_v53 = vpop.f32.mrb[15].mxu1  ;;  %v2782_v11 = vld [vmem:[#allocation2 + $0x244] ss:$12 sps:$4 sm:$0xff]  }
 0x11f   :  { %v407_v40 = vmax.f32 %v223_v27, 0.0  ;;  %v405_v59 = vmax.f32 %v332_v45, 0.0  ;;  %v336_v60 = vadd.f32 %v335_v53, %v3129_v36 }
 0x120   :  { %v454_v43 = vpack.c.bf16 %v406_v34, %v402_v32  ;;  %v408_v63 = vmax.f32 %v334_v52, 0.0 }
 0x121   :  { %v455_v47 = vpack.c.bf16 %v407_v40, %v403_v39  ;;  %1255 = vmatpush1.bf16.msra.mxu0 %v2768_v28  ;;  %v226_v48 = vpop.f32.mrb[16].mxu0  ;;  %2443 = vmatpush3.bf16.msra.mxu1 %v2795_v30  ;;  %v409_v3 = vmax.f32 %v336_v60, 0.0  ;;  %v2786_v39 = vld [vmem:[#allocation2 + $0x25c] ss:$12 sps:$4 sm:$0xff]  }
 0x122   :  { %v227_v54 = vadd.f32 %v226_v48, %v3114_v24  ;;  %v228_v56 = vpop.f32.mrb[17].mxu0  ;;  %1256 = vmatprep.subr.bf16.mxu0 %v2774_v29  ;;  %2444 = vmatprep.subr.bf16.mxu1 %v2799_v35  ;;  %v3176_v7 = vpack.c.bf16 %v408_v63, %v404_v50  ;;  %v2780_v29 = vld [vmem:[#allocation2 + $0x240] ss:$12 sps:$4 sm:$0xff]  }
 0x123   :  { %v229_v61 = vadd.f32 %v228_v56, %v3118_v25  ;;  %v230_v62 = vpop.f32.mrb[18].mxu0  ;;  %1193 = vmatprep.mubr.bf16.mxu0 %v455_v47  ;;  %1413 = vmatprep.mubr.bf16.mxu1 %v455_v47  ;;  %v3178_v13 = vpack.c.bf16 %v409_v3, %v405_v59  ;;  %v339_v14 = vpop.f32.mrb[16].mxu1 }
 0x124   :  { %v231_v1 = vadd.f32 %v230_v62, %v3114_v24  ;;  %v232_v2 = vpop.f32.mrb[19].mxu0  ;;  %1194 = vmatmul.mubr.bf16.gmra.mrb[44].mxu0 %v454_v43  ;;  %1414 = vmatmul.mubr.bf16.gmra.mrb[44].mxu1 %v454_v43  ;;  %v410_v9 = vmax.f32 %v227_v54, 0.0  ;;  %v340_v17 = vadd.f32 %v339_v14, %v3126_v33  ;;  %v341_v18 = vpop.f32.mrb[17].mxu1  ;;  %v2790_v54 = vld [vmem:[#allocation2 + $0x274] ss:$12 sps:$4 sm:$0xff]  }
 0x125   :  { %v233_v4 = vadd.f32 %v232_v2, %v3118_v25  ;;  %1257 = vmatpush1.bf16.msra.mxu0 %v2772_v44  ;;  %2445 = vmatpush3.bf16.msra.mxu1 %v2803_v49  ;;  %v411_v15 = vmax.f32 %v229_v61, 0.0  ;;  %v342_v19 = vadd.f32 %v341_v18, %v3129_v36  ;;  %v343_v22 = vpop.f32.mrb[18].mxu1  ;;  %v2784_v49 = vld [vmem:[#allocation2 + $0x258] ss:$12 sps:$4 sm:$0xff]  }
 0x126   :  { %v414_v10 = vmax.f32 %v231_v1, 0.0  ;;  %1258 = vmatprep.subr.bf16.mxu0 %v2778_v57  ;;  %2446 = vmatprep.subr.bf16.mxu1 %v2807_v58  ;;  %v412_v30 = vmax.f32 %v340_v17, 0.0  ;;  %v344_v32 = vadd.f32 %v343_v22, %v3126_v33  ;;  %v345_v34 = vpop.f32.mrb[19].mxu1  ;;  %v2794_v14 = vld [vmem:[#allocation2 + $0x28c] ss:$12 sps:$4 sm:$0xff]  }
 0x127   :  { %v415_v16 = vmax.f32 %v233_v4, 0.0  ;;  %v413_v40 = vmax.f32 %v342_v19, 0.0  ;;  %v346_v41 = vadd.f32 %v345_v34, %v3129_v36  ;;  %v2788_v4 = vld [vmem:[#allocation2 + $0x270] ss:$12 sps:$4 sm:$0xff]  }
 0x128   :  { %v458_v0 = vpack.c.bf16 %v414_v10, %v410_v9  ;;  %v416_v44 = vmax.f32 %v344_v32, 0.0 }
 0x129   :  { %v459_v27 = vpack.c.bf16 %v415_v16, %v411_v15  ;;  %1259 = vmatpush1.bf16.msra.mxu0 %v2776_v5  ;;  %v236_v28 = vpop.f32.mrb[20].mxu0  ;;  %2447 = vmatpush3.bf16.msra.mxu1 %v2811_v6  ;;  %v417_v47 = vmax.f32 %v346_v41, 0.0 }
 0x12a   :  { %v237_v35 = vadd.f32 %v236_v28, %v3114_v24  ;;  %v238_v38 = vpop.f32.mrb[21].mxu0  ;;  %1260 = vmatprep.subr.bf16.mxu0 %v2782_v11  ;;  %v3188_v50 = vpack.c.bf16 %v416_v44, %v412_v30 }
 0x12b   :  { %v239_v42 = vadd.f32 %v238_v38, %v3118_v25  ;;  %v240_v43 = vpop.f32.mrb[22].mxu0  ;;  %1203 = vmatprep.mubr.bf16.mxu0 %v459_v27  ;;  %1421 = vmatprep.mubr.bf16.mxu1 %v459_v27  ;;  %v3190_v56 = vpack.c.bf16 %v417_v47, %v413_v40  ;;  %v349_v57 = vpop.f32.mrb[20].mxu1 }
 0x12c   :  { %v241_v45 = vadd.f32 %v240_v43, %v3114_v24  ;;  %v242_v46 = vpop.f32.mrb[23].mxu0  ;;  %1204 = vmatmul.mubr.bf16.gmra.mrb[48].mxu0 %v458_v0  ;;  %1422 = vmatmul.mubr.bf16.gmra.mrb[48].mxu1 %v458_v0  ;;  %v418_v52 = vmax.f32 %v237_v35, 0.0  ;;  %v350_v60 = vadd.f32 %v349_v57, %v3126_v33  ;;  %v351_v61 = vpop.f32.mrb[21].mxu1  ;;  %v2798_v35 = vld [vmem:[#allocation2 + $0x2a4] ss:$12 sps:$4 sm:$0xff]  }
 0x12d   :  { %v243_v48 = vadd.f32 %v242_v46, %v3118_v25  ;;  %1261 = vmatpush1.bf16.msra.mxu0 %v2780_v29  ;;  %v419_v58 = vmax.f32 %v239_v42, 0.0  ;;  %v352_v63 = vadd.f32 %v351_v61, %v3129_v36  ;;  %v353_v1 = vpop.f32.mrb[22].mxu1  ;;  %v2792_v29 = vld [vmem:[#allocation2 + $0x288] ss:$12 sps:$4 sm:$0xff]  }
 0x12e   :  { %v422_v53 = vmax.f32 %v241_v45, 0.0  ;;  %1262 = vmatprep.subr.bf16.mxu0 %v2786_v39  ;;  %v420_v5 = vmax.f32 %v350_v60, 0.0  ;;  %v354_v6 = vadd.f32 %v353_v1, %v3126_v33  ;;  %v355_v9 = vpop.f32.mrb[23].mxu1 }
 0x12f   :  { %v423_v59 = vmax.f32 %v243_v48, 0.0  ;;  %v421_v15 = vmax.f32 %v352_v63, 0.0  ;;  %v356_v16 = vadd.f32 %v355_v9, %v3129_v36 }
 0x130   :  { %v462_v62 = vpack.c.bf16 %v422_v53, %v418_v52  ;;  %v424_v0 = vmax.f32 %v354_v6, 0.0  ;;  %v2800_v6 = vld [vmem:[#allocation2 + $0x2b8] ss:$12 sps:$4 sm:$0xff]  }
 0x131   :  { %v463_v2 = vpack.c.bf16 %v423_v59, %v419_v58  ;;  %1263 = vmatpush1.bf16.msra.mxu0 %v2784_v49  ;;  %v246_v3 = vpop.f32.mrb[24].mxu0  ;;  %v425_v27 = vmax.f32 %v356_v16, 0.0  ;;  %v2796_v49 = vld [vmem:[#allocation2 + $0x2a0] ss:$12 sps:$4 sm:$0xff]   ;;  %v2802_v59 = vld [vmem:[#allocation2 + $0x2bc] ss:$12 sps:$4 sm:$0xff]  }
 0x132   :  { %v247_v10 = vadd.f32 %v246_v3, %v3114_v24  ;;  %v248_v11 = vpop.f32.mrb[25].mxu0  ;;  %1264 = vmatprep.subr.bf16.mxu0 %v2790_v54  ;;  %v3200_v30 = vpack.c.bf16 %v424_v0, %v420_v5 }
 0x133   :  { %v249_v17 = vadd.f32 %v248_v11, %v3118_v25  ;;  %v250_v18 = vpop.f32.mrb[26].mxu0  ;;  %1213 = vmatprep.mubr.bf16.mxu0 %v463_v2  ;;  %1429 = vmatprep.mubr.bf16.mxu1 %v463_v2  ;;  %v3202_v38 = vpack.c.bf16 %v425_v27, %v421_v15  ;;  %v359_v39 = vpop.f32.mrb[24].mxu1 }
 0x134   :  { %v251_v19 = vadd.f32 %v250_v18, %v3114_v24  ;;  %v252_v22 = vpop.f32.mrb[27].mxu0  ;;  %1214 = vmatmul.mubr.bf16.gmra.mrb[52].mxu0 %v462_v62  ;;  %1430 = vmatmul.mubr.bf16.gmra.mrb[52].mxu1 %v462_v62  ;;  %v426_v32 = vmax.f32 %v247_v10, 0.0  ;;  %v360_v42 = vadd.f32 %v359_v39, %v3126_v33  ;;  %v361_v43 = vpop.f32.mrb[25].mxu1 }
 0x135   :  { %v253_v28 = vadd.f32 %v252_v22, %v3118_v25  ;;  %1265 = vmatpush1.bf16.msra.mxu0 %v2788_v4  ;;  %v427_v40 = vmax.f32 %v249_v17, 0.0  ;;  %v362_v45 = vadd.f32 %v361_v43, %v3129_v36  ;;  %v363_v46 = vpop.f32.mrb[26].mxu1  ;;  %v2808_v43 = vld [vmem:[#allocation2 + $0x2e8] ss:$12 sps:$4 sm:$0xff]  }
 0x136   :  { %v430_v34 = vmax.f32 %v251_v19, 0.0  ;;  %1266 = vmatprep.subr.bf16.mxu0 %v2794_v14  ;;  %v428_v52 = vmax.f32 %v360_v42, 0.0  ;;  %v364_v53 = vadd.f32 %v363_v46, %v3126_v33  ;;  %v365_v54 = vpop.f32.mrb[27].mxu1  ;;  %v2806_v14 = vld [vmem:[#allocation2 + $0x2d4] ss:$12 sps:$4 sm:$0xff]  }
 0x137   :  { %v431_v41 = vmax.f32 %v253_v28, 0.0  ;;  %v429_v60 = vmax.f32 %v362_v45, 0.0  ;;  %v366_v61 = vadd.f32 %v365_v54, %v3129_v36  ;;  %v2804_v28 = vld [vmem:[#allocation2 + $0x2d0] ss:$12 sps:$4 sm:$0xff]   ;;  %v2825_v45 = vld [vmem:[#allocation5 + $0x88] sm:$0xff]  }
 0x138   :  { %v466_v44 = vpack.c.bf16 %v430_v34, %v426_v32  ;;  %v432_v1 = vmax.f32 %v364_v53, 0.0  ;;  %v2828_v46 = vld [vmem:[#allocation5 + $0x90] sm:$0xff]   ;;  %v2830_v53 = vld [vmem:[#allocation5 + $0x78] sm:$0xff]  }
 0x139   :  { %v467_v47 = vpack.c.bf16 %v431_v41, %v427_v40  ;;  %1267 = vmatpush1.bf16.msra.mxu0 %v2792_v29  ;;  %v256_v48 = vpop.f32.mrb[28].mxu0  ;;  %v433_v4 = vmax.f32 %v366_v61, 0.0  ;;  %v2831_v54 = vld [vmem:[#allocation5 + $0x38] sm:$0xff]  }
 0x13a   :  { %v257_v57 = vadd.f32 %v256_v48, %v3114_v24  ;;  %v258_v58 = vpop.f32.mrb[29].mxu0  ;;  %1268 = vmatprep.subr.bf16.mxu0 %v2798_v35  ;;  %v3212_v9 = vpack.c.bf16 %v432_v1, %v428_v52  ;;  %v2810_v35 = vld [vmem:[#allocation2 + $0x2ec] ss:$12 sps:$4 sm:$0xff]   ;;  %v2827_v48 = vld [vmem:[#allocation5 + $0x30] sm:$0xff]   ;;  %v2832_v52 = vld [vmem:[#allocation5 + $0xa0] sm:$0xff]  }
 0x13b   :  { %v259_v62 = vadd.f32 %v258_v58, %v3118_v25  ;;  %v260_v63 = vpop.f32.mrb[30].mxu0  ;;  %1223 = vmatprep.mubr.bf16.mxu0 %v467_v47  ;;  %1437 = vmatprep.mubr.bf16.mxu1 %v467_v47  ;;  %v469_v15 = vpack.c.bf16 %v433_v4, %v429_v60  ;;  %v369_v16 = vpop.f32.mrb[28].mxu1  ;;  %v2826_v47 = vld [vmem:[#allocation5 + $0x70] sm:$0xff]  }
 0x13c   :  { %v261_v2 = vadd.f32 %v260_v63, %v3114_v24  ;;  %v262_v3 = vpop.f32.mrb[31].mxu0  ;;  %1224 = vmatmul.mubr.bf16.gmra.mrb[56].mxu0 %v466_v44  ;;  %1438 = vmatmul.mubr.bf16.gmra.mrb[56].mxu1 %v466_v44  ;;  %v434_v10 = vmax.f32 %v257_v57, 0.0  ;;  %v370_v24 = vadd.f32 %v369_v16, %v3126_v33  ;;  %v371_v0 = vpop.f32.mrb[29].mxu1  ;;  %v2833_v57 = vld [vmem:[#allocation5 + $0xa8] sm:$0xff]   ;;  %v2834_v58 = vld [vmem:[#allocation5 + $0xb0] sm:$0xff]  }
 0x13d   :  { %v263_v5 = vadd.f32 %v262_v3, %v3118_v25  ;;  %1269 = vmatpush1.bf16.msra.mxu0 %v2796_v49  ;;  %v435_v17 = vmax.f32 %v259_v62, 0.0  ;;  %v372_v22 = vadd.f32 %v371_v0, %v3129_v36  ;;  %v373_v27 = vpop.f32.mrb[30].mxu1  ;;  %v2829_v49 = vld [vmem:[#allocation5 + $0x98] sm:$0xff]  }
 0x13e   :  { %v438_v11 = vmax.f32 %v261_v2, 0.0  ;;  %1270 = vmatprep.subr.bf16.mxu0 %v2802_v59  ;;  %v436_v29 = vmax.f32 %v370_v24, 0.0  ;;  %v374_v32 = vadd.f32 %v373_v27, %v3126_v33  ;;  %v375_v34 = vpop.f32.mrb[31].mxu1  ;;  %v2835_v59 = vld [vmem:[#allocation5 + $0xb8] sm:$0xff]  }
 0x13f   :  { %v439_v18 = vmax.f32 %v263_v5, 0.0  ;;  %v437_v39 = vmax.f32 %v372_v22, 0.0  ;;  %v376_v40 = vadd.f32 %v375_v34, %v3129_v36  ;;  %v2812_v36 = vld [vmem:[#allocation5 + $0x40] sm:$0xff]  }
 0x140   :  { %v470_v19 = vpack.c.bf16 %v438_v11, %v434_v10  ;;  %v440_v41 = vmax.f32 %v374_v32, 0.0 }
 0x141   :  { %v471_v25 = vpack.c.bf16 %v439_v18, %v435_v17  ;;  %1271 = vmatpush1.bf16.msra.mxu0 %v2800_v6  ;;  %v441_v42 = vmax.f32 %v376_v40, 0.0 }
 0x142   :  { %1272 = vmatprep.subr.bf16.mxu0 %v2806_v14  ;;  %v472_v44 = vpack.c.bf16 %v440_v41, %v436_v29 }
 0x143   :  { %1233 = vmatprep.mubr.bf16.mxu0 %v471_v25  ;;  %1445 = vmatprep.mubr.bf16.mxu1 %v471_v25  ;;  %v473_v33 = vpack.c.bf16 %v441_v42, %v437_v39 }
 0x144   :  { %1234 = vmatmul.mubr.bf16.gmra.mrb[60].mxu0 %v470_v19  ;;  %1446 = vmatmul.mubr.bf16.gmra.mrb[60].mxu1 %v470_v19 }
 0x145   :  { %1273 = vmatpush1.bf16.msra.mxu0 %v2804_v28  ;;  %1276 = vmatprep.mubr.bf16.mxu0 %v3142_v12 }
 0x146   :  { %1274 = vmatprep.subr.bf16.mxu0 %v2810_v35  ;;  %1486 = vmatprep.mubr.bf16.mxu1 %v3142_v12  ;;  %v2814_v12 = vld [vmem:[#allocation5 + $0x48] sm:$0xff]  }
 0x149   :  { %1275 = vmatpush1.bf16.msra.mxu0 %v2808_v43 }
 0x14a   :  { %2496 = vmatprep.subr.bf16.mxu0 %v2812_v36 }
 0x14c   :  { %1277 = vmatmul.mubr.bf16.vlgmr.msra.gmra.mrb[32].mxu0 %v3140_v8  ;;  %1487 = vmatmul.mubr.bf16.vlgmr.msra.gmra.mrb[64].mxu1 %v3140_v8  ;;  %v2813_v8 = vld [vmem:[#allocation5] sm:$0xff]  }
 0x14d   :  { %1286 = vmatprep.mubr.bf16.mxu0 %v3154_v55  ;;  %1494 = vmatprep.mubr.bf16.mxu1 %v3154_v55  ;;  %v2816_v55 = vld [vmem:[#allocation5 + $0x50] sm:$0xff]  }
 0x14e   :  { %2497 = vmatpush3.bf16.msra.mxu0 %v2813_v8 }
 0x14f   :  { %2498 = vmatprep.subr.bf16.mxu0 %v2814_v12 }
 0x154   :  { %1287 = vmatmul.mubr.bf16.gmra.mrb[36].mxu0 %v3152_v51  ;;  %1495 = vmatmul.mubr.bf16.gmra.mrb[68].mxu1 %v3152_v51  ;;  %v2815_v51 = vld [vmem:[#allocation5 + $0x8] sm:$0xff]  }
 0x155   :  { %1296 = vmatprep.mubr.bf16.mxu0 %v3166_v37  ;;  %1502 = vmatprep.mubr.bf16.mxu1 %v3166_v37  ;;  %v2818_v37 = vld [vmem:[#allocation5 + $0x58] sm:$0xff]  }
 0x156   :  { %2499 = vmatpush3.bf16.msra.mxu0 %v2815_v51 }
 0x157   :  { %2500 = vmatprep.subr.bf16.mxu0 %v2816_v55 }
 0x15c   :  { %1297 = vmatmul.mubr.bf16.gmra.mrb[40].mxu0 %v3164_v31  ;;  %1503 = vmatmul.mubr.bf16.gmra.mrb[72].mxu1 %v3164_v31  ;;  %v2817_v31 = vld [vmem:[#allocation5 + $0x10] sm:$0xff]  }
 0x15d   :  { %1306 = vmatprep.mubr.bf16.mxu0 %v3178_v13  ;;  %1510 = vmatprep.mubr.bf16.mxu1 %v3178_v13  ;;  %v2820_v13 = vld [vmem:[#allocation5 + $0x60] sm:$0xff]  }
 0x15e   :  { %2501 = vmatpush3.bf16.msra.mxu0 %v2817_v31 }
 0x15f   :  { %2502 = vmatprep.subr.bf16.mxu0 %v2818_v37 }
 0x164   :  { %1307 = vmatmul.mubr.bf16.gmra.mrb[44].mxu0 %v3176_v7  ;;  %1511 = vmatmul.mubr.bf16.gmra.mrb[76].mxu1 %v3176_v7  ;;  %v2819_v7 = vld [vmem:[#allocation5 + $0x18] sm:$0xff]  }
 0x165   :  { %1316 = vmatprep.mubr.bf16.mxu0 %v3190_v56  ;;  %1518 = vmatprep.mubr.bf16.mxu1 %v3190_v56  ;;  %v2822_v56 = vld [vmem:[#allocation5 + $0x80] sm:$0xff]  }
 0x166   :  { %2503 = vmatpush3.bf16.msra.mxu0 %v2819_v7  ;;  %2576 = vmatprep.subr.bf16.mxu1 %v2822_v56 }
 0x167   :  { %2504 = vmatprep.subr.bf16.mxu0 %v2820_v13  ;;  %2577 = vmatpush3.bf16.msra.mxu1 %v2822_v56  ;;  %v602_v56 = vld [vmem:[%s3389_s4] sm:$0x7] }
 0x168   :  { %2578 = vmatprep.subr.bf16.mxu1 %v2825_v45 }
 0x16b   :  { %2579 = vmatpush3.bf16.msra.mxu1 %v2825_v45  ;;  %v3277_v45 = vrot.slane %v602_v56, %v86_v21 }
 0x16c   :  { %1317 = vmatmul.mubr.bf16.gmra.mrb[48].mxu0 %v3188_v50  ;;  %1519 = vmatmul.mubr.bf16.gmra.mrb[80].mxu1 %v3188_v50  ;;  %v2821_v50 = vld [vmem:[#allocation5 + $0x20] sm:$0xff]  }
 0x16d   :  { %1326 = vmatprep.mubr.bf16.mxu0 %v3202_v38  ;;  %1526 = vmatprep.mubr.bf16.mxu1 %v3202_v38  ;;  %v2824_v38 = vld [vmem:[#allocation5 + $0x28] sm:$0xff]  }
 0x16e   :  { %2505 = vmatpush3.bf16.msra.mxu0 %v2821_v50  ;;  %2580 = vmatprep.subr.bf16.mxu1 %v2828_v46 }
 0x16f   :  { %2581 = vmatpush3.bf16.msra.mxu1 %v2828_v46  ;;  %v3281_v46 = vrot.slane %v602_v56, %v94_v26 }
 0x170   :  { %2582 = vmatprep.subr.bf16.mxu1 %v2829_v49 }
 0x173   :  { %2583 = vmatpush3.bf16.msra.mxu1 %v2829_v49 }
 0x174   :  { %1327 = vmatmul.mubr.bf16.gmra.mrb[52].mxu0 %v3200_v30  ;;  %1527 = vmatmul.mubr.bf16.gmra.mrb[84].mxu1 %v3200_v30  ;;  %v2823_v30 = vld [vmem:[#allocation5 + $0x68] sm:$0xff]  }
 0x175   :  { %1336 = vmatprep.mubr.bf16.mxu0 %v469_v15  ;;  %1534 = vmatprep.mubr.bf16.mxu1 %v469_v15 }
 0x176   :  { %2506 = vmatprep.subr.bf16.mxu0 %v2823_v30  ;;  %2584 = vmatprep.subr.bf16.mxu1 %v2832_v52 }
 0x177   :  { %2507 = vmatpush3.bf16.msra.mxu0 %v2824_v38  ;;  %2585 = vmatpush3.bf16.msra.mxu1 %v2832_v52 }
 0x178   :  { %2508 = vmatprep.subr.bf16.mxu0 %v2826_v47  ;;  %2586 = vmatprep.subr.bf16.mxu1 %v2833_v57  ;;  %v3285_v47 = vrot.slane %v602_v56, %v90_v23 }
 0x17b   :  { %2509 = vmatpush3.bf16.msra.mxu0 %v2827_v48  ;;  %2587 = vmatpush3.bf16.msra.mxu1 %v2833_v57 }
 0x17c   :  { %1337 = vmatmul.mubr.bf16.gmra.mrb[56].mxu0 %v3212_v9  ;;  %1535 = vmatmul.mubr.bf16.gmra.mrb[88].mxu1 %v3212_v9 }
 0x17d   :  { %1346 = vmatprep.mubr.bf16.mxu0 %v473_v33  ;;  %1542 = vmatprep.mubr.bf16.mxu1 %v473_v33 }
 0x17e   :  { %2510 = vmatprep.subr.bf16.mxu0 %v2830_v53  ;;  %2588 = vmatprep.subr.bf16.mxu1 %v2834_v58 }
 0x17f   :  { %2511 = vmatpush3.bf16.msra.mxu0 %v2831_v54  ;;  %2589 = vmatpush3.bf16.msra.mxu1 %v2834_v58 }
 0x180   :  { %2590 = vmatprep.subr.bf16.mxu1 %v2835_v59 }
 0x183   :  { %2591 = vmatpush3.bf16.msra.mxu1 %v2835_v59 }
 0x184   :  { %1347 = vmatmul.mubr.bf16.gmra.mrb[60].mxu0 %v472_v44  ;;  %1543 = vmatmul.mubr.bf16.gmra.mrb[92].mxu1 %v472_v44 }
 0x1df   :  { %v2384_v60 = vpop.f32.mrb[32].mxu1 }
 0x1e0   :  { %v2385_v61 = vpop.f32.mrb[33].mxu1 }
 0x1e1   :  { %v2386_v62 = vadd.f32 %v2385_v61, %v2384_v60  ;;  %v2387_v63 = vpop.f32.mrb[34].mxu1 }
 0x1e2   :  { %v2388_v1 = vpop.f32.mrb[35].mxu1 }
 0x1e3   :  { %v2389_v2 = vadd.f32 %v2388_v1, %v2387_v63  ;;  %v1392_v57 = vadd.f32 %v2386_v62, %v3281_v46 }
 0x1e5   :  { %v1395_v20 = vadd.f32 %v2389_v2, %v3281_v46 }
 0x1e7   :  { %v2390_v3 = vpop.f32.mrb[36].mxu1 }
 0x1e8   :  { %v2391_v4 = vpop.f32.mrb[37].mxu1 }
 0x1e9   :  { %v3244_v5 = vadd.f32 %v2391_v4, %v2390_v3  ;;  %v2393_v6 = vpop.f32.mrb[38].mxu1 }
 0x1ea   :  { %v2394_v9 = vpop.f32.mrb[39].mxu1 }
 0x1eb   :  { %v3246_v10 = vadd.f32 %v2394_v9, %v2393_v6  ;;  %v1400_v2 = vadd.f32 %v3244_v5, %v3281_v46 }
 0x1ef   :  { %v2396_v11 = vpop.f32.mrb[40].mxu1 }
 0x1f0   :  { %v2397_v14 = vpop.f32.mrb[41].mxu1 }
 0x1f1   :  { %v3248_v15 = vadd.f32 %v2397_v14, %v2396_v11  ;;  %v2399_v16 = vpop.f32.mrb[42].mxu1 }
 0x1f2   :  { %v2400_v17 = vpop.f32.mrb[43].mxu1 }
 0x1f3   :  { %v3250_v18 = vadd.f32 %v2400_v17, %v2399_v16 }
 0x1f7   :  { %v2402_v24 = vpop.f32.mrb[44].mxu1 }
 0x1f8   :  { %v2403_v0 = vpop.f32.mrb[45].mxu1 }
 0x1f9   :  { %v3252_v19 = vadd.f32 %v2403_v0, %v2402_v24  ;;  %v2405_v22 = vpop.f32.mrb[46].mxu1 }
 0x1fa   :  { %v2406_v27 = vpop.f32.mrb[47].mxu1 }
 0x1fb   :  { %v3254_v25 = vadd.f32 %v2406_v27, %v2405_v22 }
 0x1ff   :  { %v2408_v28 = vpop.f32.mrb[48].mxu1 }
 0x200   :  { %v2409_v29 = vpop.f32.mrb[49].mxu1 }
 0x201   :  { %v3256_v32 = vadd.f32 %v2409_v29, %v2408_v28  ;;  %v2411_v34 = vpop.f32.mrb[50].mxu1 }
 0x202   :  { %v2412_v35 = vpop.f32.mrb[51].mxu1 }
 0x203   :  { %v3258_v39 = vadd.f32 %v2412_v35, %v2411_v34 }
 0x207   :  { %v2414_v40 = vpop.f32.mrb[52].mxu1 }
 0x208   :  { %v2415_v41 = vpop.f32.mrb[53].mxu1 }
 0x209   :  { %v3260_v42 = vadd.f32 %v2415_v41, %v2414_v40  ;;  %v2417_v43 = vpop.f32.mrb[54].mxu1 }
 0x20a   :  { %v2418_v44 = vpop.f32.mrb[55].mxu1 }
 0x20b   :  { %v3262_v33 = vadd.f32 %v2418_v44, %v2417_v43 }
 0x20f   :  { %v2420_v36 = vpop.f32.mrb[56].mxu1 }
 0x210   :  { %v2421_v8 = vpop.f32.mrb[57].mxu1 }
 0x211   :  { %v3264_v12 = vadd.f32 %v2421_v8, %v2420_v36  ;;  %v2423_v51 = vpop.f32.mrb[58].mxu1 }
 0x212   :  { %v2424_v55 = vpop.f32.mrb[59].mxu1 }
 0x213   :  { %v3266_v31 = vadd.f32 %v2424_v55, %v2423_v51  ;;  %v1403_v51 = vadd.f32 %v3246_v10, %v3281_v46 }
 0x217   :  { %v2426_v37 = vpop.f32.mrb[60].mxu1 }
 0x218   :  { %v2427_v7 = vpop.f32.mrb[61].mxu1 }
 0x219   :  { %v3268_v13 = vadd.f32 %v2427_v7, %v2426_v37  ;;  %v2429_v50 = vpop.f32.mrb[62].mxu1 }
 0x21a   :  { %v2430_v30 = vpop.f32.mrb[63].mxu1 }
 0x21b   :  { %v3273_v38 = vadd.f32 %v2430_v30, %v2429_v50 }
 0x21f   :  { %v1278_v48 = vpop.f32.mrb[32].mxu0  ;;  %v2448_v49 = vpop.f32.mrb[64].mxu1 }
 0x220   :  { %v2608_v52 = vadd.f32 %v1278_v48, %v3277_v45  ;;  %v1280_v53 = vpop.f32.mrb[33].mxu0  ;;  %v2449_v54 = vpop.f32.mrb[65].mxu1 }
 0x221   :  { %v2609_v58 = vadd.f32 %v1280_v53, %v3285_v47  ;;  %v2450_v21 = vadd.f32 %v2449_v54, %v2448_v49  ;;  %v1282_v59 = vpop.f32.mrb[34].mxu0  ;;  %v2451_v60 = vpop.f32.mrb[66].mxu1 }
 0x222   :  { %v2610_v26 = vadd.f32 %v1282_v59, %v3277_v45  ;;  %v1284_v61 = vpop.f32.mrb[35].mxu0  ;;  %v2452_v63 = vpop.f32.mrb[67].mxu1  ;;  %v1551_v4 = vmax.f32 %v2608_v52, 0.0 }
 0x223   :  { %v1489_v23 = vadd.f32 %v2450_v21, %v1392_v57  ;;  %v2611_v1 = vadd.f32 %v1284_v61, %v3285_v47  ;;  %v2453_v3 = vadd.f32 %v2452_v63, %v2451_v60  ;;  %v1552_v9 = vmax.f32 %v2609_v58, 0.0 }
 0x224   :  { %v1554_v6 = vmax.f32 %v2610_v26, 0.0  ;;  %v1408_v60 = vadd.f32 %v3248_v15, %v3281_v46 }
 0x225   :  { %v1555_v11 = vmax.f32 %v2611_v1, 0.0  ;;  %v1492_v62 = vadd.f32 %v2453_v3, %v1395_v20  ;;  %v1553_v16 = vmax.f32 %v1489_v23, 0.0 }
 0x226   :  { %v1599_v14 = vpack.c.bf16 %v1554_v6, %v1551_v4  ;;  %v1411_v6 = vadd.f32 %v3250_v18, %v3281_v46 }
 0x227   :  { %v1600_v17 = vpack.c.bf16 %v1555_v11, %v1552_v9  ;;  %v1556_v24 = vmax.f32 %v1492_v62, 0.0  ;;  %v1288_v0 = vpop.f32.mrb[36].mxu0  ;;  %v2454_v22 = vpop.f32.mrb[68].mxu1 }
 0x228   :  { %v2612_v27 = vadd.f32 %v1288_v0, %v3277_v45  ;;  %v1290_v28 = vpop.f32.mrb[37].mxu0  ;;  %v2455_v29 = vpop.f32.mrb[69].mxu1 }
 0x229   :  { %v2613_v34 = vadd.f32 %v1290_v28, %v3285_v47  ;;  %v2456_v35 = vadd.f32 %v2455_v29, %v2454_v22  ;;  %v1292_v40 = vpop.f32.mrb[38].mxu0  ;;  %v2457_v41 = vpop.f32.mrb[70].mxu1  ;;  %1854 = vmatprep.mubr.bf16.mxu0 %v1600_v17  ;;  %v1601_v43 = vpack.c.bf16 %v1556_v24, %v1553_v16 }
 0x22a   :  { %v2614_v44 = vadd.f32 %v1292_v40, %v3277_v45  ;;  %v1294_v36 = vpop.f32.mrb[39].mxu0  ;;  %v2458_v8 = vpop.f32.mrb[71].mxu1  ;;  %1855 = vmatmul.mubr.bf16.vlgmr.msra.gmra.mrb[64].mxu0 %v1599_v14  ;;  %v1557_v5 = vmax.f32 %v2612_v27, 0.0  ;;  %v1416_v40 = vadd.f32 %v3252_v19, %v3281_v46 }
 0x22b   :  { %v1497_v55 = vadd.f32 %v2456_v35, %v1400_v2  ;;  %v2615_v37 = vadd.f32 %v1294_v36, %v3285_v47  ;;  %v2459_v7 = vadd.f32 %v2458_v8, %v2457_v41  ;;  %2592 = vmatprep.mubr.bf16.mxu1 %v1601_v43  ;;  %v1558_v56 = vmax.f32 %v2613_v34, 0.0 }
 0x22c   :  { %v1560_v50 = vmax.f32 %v2614_v44, 0.0 }
 0x22d   :  { %v1561_v30 = vmax.f32 %v2615_v37, 0.0  ;;  %v1500_v48 = vadd.f32 %v2459_v7, %v1403_v51  ;;  %v1559_v52 = vmax.f32 %v1497_v55, 0.0  ;;  %v1419_v7 = vadd.f32 %v3254_v25, %v3281_v46 }
 0x22e   :  { %v1602_v49 = vpack.c.bf16 %v1560_v50, %v1557_v5 }
 0x22f   :  { %v1603_v53 = vpack.c.bf16 %v1561_v30, %v1558_v56  ;;  %v1562_v54 = vmax.f32 %v1500_v48, 0.0  ;;  %v1298_v57 = vpop.f32.mrb[40].mxu0  ;;  %v2460_v58 = vpop.f32.mrb[72].mxu1 }
 0x230   :  { %v2616_v21 = vadd.f32 %v1298_v57, %v3277_v45  ;;  %v1300_v59 = vpop.f32.mrb[41].mxu0  ;;  %v2461_v10 = vpop.f32.mrb[73].mxu1 }
 0x231   :  { %v1604_v26 = vpack.c.bf16 %v1562_v54, %v1559_v52  ;;  %v2617_v61 = vadd.f32 %v1300_v59, %v3285_v47  ;;  %v2462_v63 = vadd.f32 %v2461_v10, %v2460_v58  ;;  %v1302_v20 = vpop.f32.mrb[42].mxu0  ;;  %v2463_v23 = vpop.f32.mrb[74].mxu1  ;;  %1862 = vmatprep.mubr.bf16.mxu0 %v1603_v53 }
 0x232   :  { %v2618_v1 = vadd.f32 %v1302_v20, %v3277_v45  ;;  %v1304_v3 = vpop.f32.mrb[43].mxu0  ;;  %v2464_v4 = vpop.f32.mrb[75].mxu1  ;;  %1863 = vmatmul.mubr.bf16.gmra.mrb[68].mxu0 %v1602_v49  ;;  %v1563_v15 = vmax.f32 %v2616_v21, 0.0 }
 0x233   :  { %v1505_v9 = vadd.f32 %v2462_v63, %v1408_v60  ;;  %v2619_v11 = vadd.f32 %v1304_v3, %v3285_v47  ;;  %v2465_v62 = vadd.f32 %v2464_v4, %v2463_v23  ;;  %2593 = vmatmul.mubr.bf16.vlgmr.msra.gmra.mrb[96].mxu1 %v1604_v26  ;;  %v1564_v16 = vmax.f32 %v2617_v61, 0.0 }
 0x234   :  { %v1566_v14 = vmax.f32 %v2618_v1, 0.0  ;;  %v1424_v26 = vadd.f32 %v3256_v32, %v3281_v46 }
 0x235   :  { %v1567_v17 = vmax.f32 %v2619_v11, 0.0  ;;  %v1508_v24 = vadd.f32 %v2465_v62, %v1411_v6  ;;  %v1565_v22 = vmax.f32 %v1505_v9, 0.0  ;;  %v1427_v9 = vadd.f32 %v3258_v39, %v3281_v46 }
 0x236   :  { %v1605_v0 = vpack.c.bf16 %v1566_v14, %v1563_v15 }
 0x237   :  { %v1606_v27 = vpack.c.bf16 %v1567_v17, %v1564_v16  ;;  %v1568_v28 = vmax.f32 %v1508_v24, 0.0  ;;  %v1308_v29 = vpop.f32.mrb[44].mxu0  ;;  %v2466_v2 = vpop.f32.mrb[76].mxu1 }
 0x238   :  { %v2620_v34 = vadd.f32 %v1308_v29, %v3277_v45  ;;  %v1310_v35 = vpop.f32.mrb[45].mxu0  ;;  %v2467_v18 = vpop.f32.mrb[77].mxu1 }
 0x239   :  { %v2621_v41 = vadd.f32 %v1310_v35, %v3285_v47  ;;  %v2468_v43 = vadd.f32 %v2467_v18, %v2466_v2  ;;  %v1312_v44 = vpop.f32.mrb[46].mxu0  ;;  %v2469_v36 = vpop.f32.mrb[78].mxu1  ;;  %1870 = vmatprep.mubr.bf16.mxu0 %v1606_v27  ;;  %v1607_v8 = vpack.c.bf16 %v1568_v28, %v1565_v22  ;;  %v1432_v18 = vadd.f32 %v3260_v42, %v3281_v46 }
 0x23a   :  { %v2622_v51 = vadd.f32 %v1312_v44, %v3277_v45  ;;  %v1314_v55 = vpop.f32.mrb[47].mxu0  ;;  %v2470_v37 = vpop.f32.mrb[79].mxu1  ;;  %1871 = vmatmul.mubr.bf16.gmra.mrb[72].mxu0 %v1605_v0  ;;  %v1569_v19 = vmax.f32 %v2620_v34, 0.0 }
 0x23b   :  { %v1513_v5 = vadd.f32 %v2468_v43, %v1416_v40  ;;  %v2623_v50 = vadd.f32 %v1314_v55, %v3285_v47  ;;  %v2471_v56 = vadd.f32 %v2470_v37, %v2469_v36  ;;  %2596 = vmatprep.mubr.bf16.mxu1 %v1607_v8  ;;  %v1570_v48 = vmax.f32 %v2621_v41, 0.0 }
 0x23c   :  { %v1572_v30 = vmax.f32 %v2622_v51, 0.0  ;;  %v1435_v37 = vadd.f32 %v3262_v33, %v3281_v46 }
 0x23d   :  { %v1573_v49 = vmax.f32 %v2623_v50, 0.0  ;;  %v1516_v52 = vadd.f32 %v2471_v56, %v1419_v7  ;;  %v1571_v54 = vmax.f32 %v1513_v5, 0.0 }
 0x23e   :  { %v1608_v53 = vpack.c.bf16 %v1572_v30, %v1569_v19 }
 0x23f   :  { %v1609_v57 = vpack.c.bf16 %v1573_v49, %v1570_v48  ;;  %v1574_v58 = vmax.f32 %v1516_v52, 0.0  ;;  %v1318_v21 = vpop.f32.mrb[48].mxu0  ;;  %v2472_v59 = vpop.f32.mrb[80].mxu1 }
 0x240   :  { %v2624_v10 = vadd.f32 %v1318_v21, %v3277_v45  ;;  %v1320_v60 = vpop.f32.mrb[49].mxu0  ;;  %v2473_v25 = vpop.f32.mrb[81].mxu1 }
 0x241   :  { %v2625_v61 = vadd.f32 %v1320_v60, %v3285_v47  ;;  %v2474_v63 = vadd.f32 %v2473_v25, %v2472_v59  ;;  %v1322_v20 = vpop.f32.mrb[50].mxu0  ;;  %v2475_v23 = vpop.f32.mrb[82].mxu1  ;;  %1878 = vmatprep.mubr.bf16.mxu0 %v1609_v57  ;;  %v1610_v1 = vpack.c.bf16 %v1574_v58, %v1571_v54 }
 0x242   :  { %v2626_v3 = vadd.f32 %v1322_v20, %v3277_v45  ;;  %v1324_v4 = vpop.f32.mrb[51].mxu0  ;;  %v2476_v6 = vpop.f32.mrb[83].mxu1  ;;  %1879 = vmatmul.mubr.bf16.gmra.mrb[76].mxu0 %v1608_v53  ;;  %v1575_v32 = vmax.f32 %v2624_v10, 0.0  ;;  %v1440_v10 = vadd.f32 %v3264_v12, %v3281_v46 }
 0x243   :  { %v1521_v11 = vadd.f32 %v2474_v63, %v1424_v26  ;;  %v2627_v62 = vadd.f32 %v1324_v4, %v3285_v47  ;;  %v2477_v15 = vadd.f32 %v2476_v6, %v2475_v23  ;;  %2597 = vmatmul.mubr.bf16.gmra.mrb[100].mxu1 %v1610_v1  ;;  %v1576_v16 = vmax.f32 %v2625_v61, 0.0 }
 0x244   :  { %v1578_v14 = vmax.f32 %v2626_v3, 0.0  ;;  %v1443_v3 = vadd.f32 %v3266_v31, %v3281_v46 }
 0x245   :  { %v1579_v17 = vmax.f32 %v2627_v62, 0.0  ;;  %v1524_v24 = vadd.f32 %v2477_v15, %v1427_v9  ;;  %v1577_v22 = vmax.f32 %v1521_v11, 0.0 }
 0x246   :  { %v1611_v0 = vpack.c.bf16 %v1578_v14, %v1575_v32 }
 0x247   :  { %v1612_v27 = vpack.c.bf16 %v1579_v17, %v1576_v16  ;;  %v1580_v28 = vmax.f32 %v1524_v24, 0.0  ;;  %v1328_v29 = vpop.f32.mrb[52].mxu0  ;;  %v2478_v2 = vpop.f32.mrb[84].mxu1 }
 0x248   :  { %v2628_v34 = vadd.f32 %v1328_v29, %v3277_v45  ;;  %v1330_v35 = vpop.f32.mrb[53].mxu0  ;;  %v2479_v39 = vpop.f32.mrb[85].mxu1  ;;  %v1448_v29 = vadd.f32 %v3268_v13, %v3281_v46 }
 0x249   :  { %v2629_v40 = vadd.f32 %v1330_v35, %v3285_v47  ;;  %v2480_v41 = vadd.f32 %v2479_v39, %v2478_v2  ;;  %v1332_v43 = vpop.f32.mrb[54].mxu0  ;;  %v2481_v44 = vpop.f32.mrb[86].mxu1  ;;  %1886 = vmatprep.mubr.bf16.mxu0 %v1612_v27  ;;  %v1613_v36 = vpack.c.bf16 %v1580_v28, %v1577_v22 }
 0x24a   :  { %v2630_v8 = vadd.f32 %v1332_v43, %v3277_v45  ;;  %v1334_v51 = vpop.f32.mrb[55].mxu0  ;;  %v2482_v55 = vpop.f32.mrb[87].mxu1  ;;  %1887 = vmatmul.mubr.bf16.gmra.mrb[80].mxu0 %v1611_v0  ;;  %v1581_v42 = vmax.f32 %v2628_v34, 0.0 }
 0x24b   :  { %v1529_v7 = vadd.f32 %v2480_v41, %v1432_v18  ;;  %v2631_v5 = vadd.f32 %v1334_v51, %v3285_v47  ;;  %v2483_v50 = vadd.f32 %v2482_v55, %v2481_v44  ;;  %2600 = vmatprep.mubr.bf16.mxu1 %v1613_v36  ;;  %v1582_v19 = vmax.f32 %v2629_v40, 0.0 }
 0x24c   :  { %v1584_v56 = vmax.f32 %v2630_v8, 0.0  ;;  %v1451_v44 = vadd.f32 %v3273_v38, %v3281_v46 }
 0x24d   :  { %v1585_v30 = vmax.f32 %v2631_v5, 0.0  ;;  %v1532_v48 = vadd.f32 %v2483_v50, %v1435_v37  ;;  %v1583_v52 = vmax.f32 %v1529_v7, 0.0 }
 0x24e   :  { %v1614_v49 = vpack.c.bf16 %v1584_v56, %v1581_v42 }
 0x24f   :  { %v1615_v53 = vpack.c.bf16 %v1585_v30, %v1582_v19  ;;  %v1586_v54 = vmax.f32 %v1532_v48, 0.0  ;;  %v1338_v57 = vpop.f32.mrb[56].mxu0  ;;  %v2484_v58 = vpop.f32.mrb[88].mxu1 }
 0x250   :  { %v2632_v21 = vadd.f32 %v1338_v57, %v3277_v45  ;;  %v1340_v59 = vpop.f32.mrb[57].mxu0  ;;  %v2485_v33 = vpop.f32.mrb[89].mxu1 }
 0x251   :  { %v2633_v60 = vadd.f32 %v1340_v59, %v3285_v47  ;;  %v2486_v25 = vadd.f32 %v2485_v33, %v2484_v58  ;;  %v1342_v26 = vpop.f32.mrb[58].mxu0  ;;  %v2487_v61 = vpop.f32.mrb[90].mxu1  ;;  %1894 = vmatprep.mubr.bf16.mxu0 %v1615_v53  ;;  %v1616_v63 = vpack.c.bf16 %v1586_v54, %v1583_v52  ;;  %v3352_v52 = vld [vmem:[%s3391_s6] ss:$0 sm:$0xff]  ;;  %s2947_s6 = smov [#allocation7]  }
 0x252   :  { %v2634_v20 = vadd.f32 %v1342_v26, %v3277_v45  ;;  %v1344_v23 = vpop.f32.mrb[59].mxu0  ;;  %v2488_v1 = vpop.f32.mrb[91].mxu1  ;;  %1895 = vmatmul.mubr.bf16.gmra.mrb[84].mxu0 %v1614_v49  ;;  %v1587_v12 = vmax.f32 %v2632_v21, 0.0  ;;  %s2133_s18 = sshll.u32 %s2947_s6, 4  ;;  %s2134_s18 = int_to_ptr.vmem [resolvable:$true] %s2133_s18 }
 0x253   :  { %v1537_v4 = vadd.f32 %v2486_v25, %v1440_v10  ;;  %v2635_v6 = vadd.f32 %v1344_v23, %v3285_v47  ;;  %v2489_v9 = vadd.f32 %v2488_v1, %v2487_v61  ;;  %2601 = vmatmul.mubr.bf16.gmra.mrb[104].mxu1 %v1616_v63  ;;  %v1588_v62 = vmax.f32 %v2633_v60, 0.0  ;;  %s2912_s19 = scalar_lea.vmem %s2134_s18, 1024  ;;  %p2917_p3 = scmp.lt.s32.totalorder %s2134_s18, %s2134_s18 }
 0x254   :  { %v1590_v11 = vmax.f32 %v2634_v20, 0.0  ;;  %p2913_p2 = scmp.ne.s32.totalorder %s2134_s18, %s2912_s19  ;;  %p2918_p4 = scmp.lt.s32.totalorder %s2912_s19, %s2912_s19 }
 0x255   :  { %v1591_v15 = vmax.f32 %v2635_v6, 0.0  ;;  %v1540_v32 = vadd.f32 %v2489_v9, %v1443_v3  ;;  %v1589_v16 = vmax.f32 %v1537_v4, 0.0 }
 0x256   :  { %v1617_v14 = vpack.c.bf16 %v1590_v11, %v1587_v12  ;;  %p2919_p5 = por %p2918_p4, %p2917_p3 }
 0x257   :  { %v1618_v17 = vpack.c.bf16 %v1591_v15, %v1588_v62  ;;  %v1592_v24 = vmax.f32 %v1540_v32, 0.0  ;;  %v1348_v0 = vpop.f32.mrb[60].mxu0  ;;  %v2490_v22 = vpop.f32.mrb[92].mxu1 }
 0x258   :  { %v2636_v27 = vadd.f32 %v1348_v0, %v3277_v45  ;;  %v1350_v28 = vpop.f32.mrb[61].mxu0  ;;  %v2491_v31 = vpop.f32.mrb[93].mxu1  ;;  %p2920_p6 = pnand %p2919_p5, %p2913_p2 }
 0x259   :  { %v2637_v2 = vadd.f32 %v1350_v28, %v3285_v47  ;;  %v2492_v34 = vadd.f32 %v2491_v31, %v2490_v22  ;;  %v1352_v35 = vpop.f32.mrb[62].mxu0  ;;  %v2493_v39 = vpop.f32.mrb[94].mxu1  ;;  %1902 = vmatprep.mubr.bf16.mxu0 %v1618_v17  ;;  %v1619_v18 = vpack.c.bf16 %v1592_v24, %v1589_v16 }
 0x25a   :  { %v2638_v40 = vadd.f32 %v1352_v35, %v3277_v45  ;;  %v1354_v41 = vpop.f32.mrb[63].mxu0  ;;  %v2494_v43 = vpop.f32.mrb[95].mxu1  ;;  %1903 = vmatmul.mubr.bf16.gmra.mrb[88].mxu0 %v1617_v14  ;;  %v1593_v13 = vmax.f32 %v2636_v27, 0.0 }
 0x25b   :  { %v1545_v36 = vadd.f32 %v2492_v34, %v1448_v29  ;;  %v2639_v8 = vadd.f32 %v1354_v41, %v3285_v47  ;;  %v2495_v51 = vadd.f32 %v2494_v43, %v2493_v39  ;;  %2604 = vmatprep.mubr.bf16.mxu1 %v1619_v18  ;;  %v1594_v37 = vmax.f32 %v2637_v2, 0.0 }
 0x25c   :  { %v1596_v55 = vmax.f32 %v2638_v40, 0.0 }
 0x25d   :  { %v1597_v7 = vmax.f32 %v2639_v8, 0.0  ;;  %v1548_v5 = vadd.f32 %v2495_v51, %v1451_v44  ;;  %v1595_v42 = vmax.f32 %v1545_v36, 0.0 }
 0x25e   :  { %v1620_v50 = vpack.c.bf16 %v1596_v55, %v1593_v13 }
 0x25f   :  { %v1621_v56 = vpack.c.bf16 %v1597_v7, %v1594_v37  ;;  %v1598_v45 = vmax.f32 %v1548_v5, 0.0 }
 0x261   :  { %1910 = vmatprep.mubr.bf16.mxu0 %v1621_v56  ;;  %v1622_v19 = vpack.c.bf16 %v1598_v45, %v1595_v42 }
 0x262   :  { %1911 = vmatmul.mubr.bf16.gmra.mrb[92].mxu0 %v1620_v50 }
 0x263   :  { %2605 = vmatmul.mubr.bf16.gmra.mrb[108].mxu1 %v1622_v19 }
 0x2fd   :  { %v2512_v30 = vpop.f32.mrb[64].mxu0 }
 0x2fe   :  { %v2513_v38 = vpop.f32.mrb[65].mxu0 }
 0x2ff   :  { %v2514_v46 = vadd.f32 %v2513_v38, %v2512_v30  ;;  %v2515_v48 = vpop.f32.mrb[66].mxu0 }
 0x300   :  { %v2516_v47 = vpop.f32.mrb[67].mxu0 }
 0x301   :  { %v2517_v49 = vadd.f32 %v2516_v47, %v2515_v48  ;;  %v1857_v58 = vadd.f32 %v2514_v46, %v3352_v52 }
 0x303   :  { %v1860_v26 = vadd.f32 %v2517_v49, %v3352_v52 }
 0x305   :  { %v2518_v53 = vpop.f32.mrb[68].mxu0 }
 0x306   :  { %v2519_v54 = vpop.f32.mrb[69].mxu0  ;;  %v2594_v57 = vpop.f32.mrb[96].mxu1 }
 0x307   :  { %v2520_v21 = vadd.f32 %v2519_v54, %v2518_v53  ;;  %v2521_v59 = vpop.f32.mrb[70].mxu0  ;;  %v1953_v33 = vpop.f32.mrb[97].mxu1 }
 0x308   :  { %v1954_v10 = vadd.f32 %v1953_v33, %v1857_v58  ;;  %v2522_v60 = vpop.f32.mrb[71].mxu0  ;;  %v2595_v25 = vpop.f32.mrb[98].mxu1 }
 0x309   :  { %v1865_v61 = vadd.f32 %v2520_v21, %v3352_v52  ;;  %v2523_v63 = vadd.f32 %v2522_v60, %v2521_v59  ;;  %v1956_v20 = vpop.f32.mrb[99].mxu1 }
 0x30a   :  { %2836 = vtanh.f32 %v1954_v10  ;;  %v1957_v23 = vadd.f32 %v1956_v20, %v1860_v26 }
 0x30b   :  { %v1962_v1 = vadd.f32 %v2594_v57, %v1865_v61  ;;  %v1868_v3 = vadd.f32 %v2523_v63, %v3352_v52 }
 0x30c   :  { %2838 = vtanh.f32 %v1957_v23 }
 0x30d   :  { %2840 = vtanh.f32 %v1962_v1  ;;  %v1965_v4 = vadd.f32 %v2595_v25, %v1868_v3  ;;  %v2524_v6 = vpop.f32.mrb[72].mxu0 }
 0x30e   :  { %v2525_v9 = vpop.f32.mrb[73].mxu0 }
 0x30f   :  { %2842 = vtanh.f32 %v1965_v4  ;;  %v2526_v12 = vadd.f32 %v2525_v9, %v2524_v6  ;;  %v2527_v11 = vpop.f32.mrb[74].mxu0 }
 0x310   :  { %v2528_v62 = vpop.f32.mrb[75].mxu0 }
 0x311   :  { %v2529_v15 = vadd.f32 %v2528_v62, %v2527_v11  ;;  %v1873_v0 = vadd.f32 %v2526_v12, %v3352_v52 }
 0x313   :  { %v1876_v18 = vadd.f32 %v2529_v15, %v3352_v52 }
 0x314   :  { %v2837_v32 = vpop.eup %2836 }
 0x315   :  { %v2530_v14 = vpop.f32.mrb[76].mxu0  ;;  %v2032_v27 = vmul.f32 2.0, %v2837_v32 }
 0x316   :  { %v2839_v16 = vpop.eup %2838  ;;  %v2531_v17 = vpop.f32.mrb[77].mxu0 }
 0x317   :  { %v2598_v24 = vpop.f32.mrb[100].mxu1  ;;  %v2841_v22 = vpop.eup %2840  ;;  %v2033_v28 = vmul.f32 2.0, %v2839_v16  ;;  %v2532_v31 = vadd.f32 %v2531_v17, %v2530_v14 }
 0x318   :  { %v2533_v29 = vpop.f32.mrb[78].mxu0  ;;  %v1969_v2 = vpop.f32.mrb[101].mxu1  ;;  %v2034_v8 = vmul.f32 2.0, %v2841_v22 }
 0x319   :  { %v1970_v34 = vadd.f32 %v1969_v2, %v1873_v0  ;;  %v2534_v35 = vpop.f32.mrb[79].mxu0  ;;  %v2599_v39 = vpop.f32.mrb[102].mxu1  ;;  %v2324_v41 = vpack.c.bf16 %v2033_v28, %v2032_v27  ;;  %v1881_v43 = vadd.f32 %v2532_v31, %v3352_v52 }
 0x31a   :  { %v2843_v40 = vpop.eup %2842  ;;  %v2535_v44 = vadd.f32 %v2534_v35, %v2533_v29  ;;  %v1972_v36 = vpop.f32.mrb[103].mxu1 }
 0x31b   :  { %v2035_v51 = vmul.f32 2.0, %v2843_v40  ;;  %2844 = vtanh.f32 %v1970_v34  ;;  %v1973_v13 = vadd.f32 %v1972_v36, %v1876_v18  ;;  %2325 = vst [vmem:[#allocation7] sm:$0xff] %v2324_v41   ;;  %v1978_v55 = vadd.f32 %v2598_v24, %v1881_v43 }
 0x31c   :  { %v1884_v37 = vadd.f32 %v2535_v44, %v3352_v52 }
 0x31d   :  { %v2329_v7 = vpack.c.bf16 %v2035_v51, %v2034_v8  ;;  %2846 = vtanh.f32 %v1973_v13  ;;  %v2536_v50 = vpop.f32.mrb[80].mxu0 }
 0x31e   :  { %2848 = vtanh.f32 %v1978_v55  ;;  %v1981_v5 = vadd.f32 %v2599_v39, %v1884_v37  ;;  %v2537_v42 = vpop.f32.mrb[81].mxu0 }
 0x31f   :  { %2361 = vst [vmem:[#allocation7 + $0x8] sm:$0xff] %v2329_v7   ;;  %v2538_v56 = vadd.f32 %v2537_v42, %v2536_v50  ;;  %v2539_v45 = vpop.f32.mrb[82].mxu0 }
 0x320   :  { %2850 = vtanh.f32 %v1981_v5  ;;  %v2540_v19 = vpop.f32.mrb[83].mxu0 }
 0x321   :  { %v2541_v30 = vadd.f32 %v2540_v19, %v2539_v45  ;;  %v1889_v53 = vadd.f32 %v2538_v56, %v3352_v52 }
 0x323   :  { %v1892_v26 = vadd.f32 %v2541_v30, %v3352_v52 }
 0x325   :  { %v2845_v38 = vpop.eup %2844  ;;  %v2542_v46 = vpop.f32.mrb[84].mxu0 }
 0x326   :  { %v2543_v47 = vpop.f32.mrb[85].mxu0  ;;  %v2602_v49 = vpop.f32.mrb[104].mxu1  ;;  %v2036_v57 = vmul.f32 2.0, %v2845_v38 }
 0x327   :  { %v2847_v48 = vpop.eup %2846  ;;  %v2544_v21 = vadd.f32 %v2543_v47, %v2542_v46  ;;  %v2545_v59 = vpop.f32.mrb[86].mxu0 }
 0x328   :  { %v2849_v54 = vpop.eup %2848  ;;  %v2037_v58 = vmul.f32 2.0, %v2847_v48  ;;  %v1985_v33 = vpop.f32.mrb[105].mxu1 }
 0x329   :  { %v1986_v10 = vadd.f32 %v1985_v33, %v1889_v53  ;;  %v2546_v60 = vpop.f32.mrb[87].mxu0  ;;  %v2603_v25 = vpop.f32.mrb[106].mxu1  ;;  %v1897_v20 = vadd.f32 %v2544_v21, %v3352_v52  ;;  %v2038_v3 = vmul.f32 2.0, %v2849_v54 }
 0x32a   :  { %v2851_v61 = vpop.eup %2850  ;;  %v2334_v63 = vpack.c.bf16 %v2037_v58, %v2036_v57  ;;  %v2547_v23 = vadd.f32 %v2546_v60, %v2545_v59  ;;  %v1988_v1 = vpop.f32.mrb[107].mxu1 }
 0x32b   :  { %v2039_v4 = vmul.f32 2.0, %v2851_v61  ;;  %2852 = vtanh.f32 %v1986_v10  ;;  %v1989_v6 = vadd.f32 %v1988_v1, %v1892_v26  ;;  %v1994_v9 = vadd.f32 %v2602_v49, %v1897_v20 }
 0x32c   :  { %2362 = vst [vmem:[#allocation7 + $0x10] sm:$0xff] %v2334_v63   ;;  %v1900_v12 = vadd.f32 %v2547_v23, %v3352_v52 }
 0x32d   :  { %v2339_v11 = vpack.c.bf16 %v2039_v4, %v2038_v3  ;;  %2854 = vtanh.f32 %v1989_v6  ;;  %v2548_v15 = vpop.f32.mrb[88].mxu0 }
 0x32e   :  { %2856 = vtanh.f32 %v1994_v9  ;;  %v1997_v62 = vadd.f32 %v2603_v25, %v1900_v12  ;;  %v2549_v32 = vpop.f32.mrb[89].mxu0 }
 0x32f   :  { %2363 = vst [vmem:[#allocation7 + $0x18] sm:$0xff] %v2339_v11   ;;  %v2550_v14 = vadd.f32 %v2549_v32, %v2548_v15  ;;  %v2551_v16 = vpop.f32.mrb[90].mxu0 }
 0x330   :  { %2858 = vtanh.f32 %v1997_v62  ;;  %v2552_v17 = vpop.f32.mrb[91].mxu0 }
 0x331   :  { %v2553_v24 = vadd.f32 %v2552_v17, %v2551_v16  ;;  %v1905_v29 = vadd.f32 %v2550_v14, %v3352_v52 }
 0x333   :  { %v1908_v36 = vadd.f32 %v2553_v24, %v3352_v52 }
 0x335   :  { %v2853_v0 = vpop.eup %2852  ;;  %v2554_v22 = vpop.f32.mrb[92].mxu0 }
 0x336   :  { %v2555_v28 = vpop.f32.mrb[93].mxu0  ;;  %v2606_v31 = vpop.f32.mrb[108].mxu1  ;;  %v2040_v34 = vmul.f32 2.0, %v2853_v0 }
 0x337   :  { %v2855_v27 = vpop.eup %2854  ;;  %v2556_v39 = vadd.f32 %v2555_v28, %v2554_v22  ;;  %v2557_v18 = vpop.f32.mrb[94].mxu0 }
 0x338   :  { %v2857_v2 = vpop.eup %2856  ;;  %v2041_v35 = vmul.f32 2.0, %v2855_v27  ;;  %v2001_v40 = vpop.f32.mrb[109].mxu1 }
 0x339   :  { %v2002_v41 = vadd.f32 %v2001_v40, %v1905_v29  ;;  %v2558_v43 = vpop.f32.mrb[95].mxu0  ;;  %v2607_v44 = vpop.f32.mrb[110].mxu1  ;;  %v1913_v13 = vadd.f32 %v2556_v39, %v3352_v52  ;;  %v2042_v7 = vmul.f32 2.0, %v2857_v2 }
 0x33a   :  { %v2859_v8 = vpop.eup %2858  ;;  %v2344_v51 = vpack.c.bf16 %v2041_v35, %v2040_v34  ;;  %v2559_v55 = vadd.f32 %v2558_v43, %v2557_v18  ;;  %v2004_v37 = vpop.f32.mrb[111].mxu1 }
 0x33b   :  { %v2043_v5 = vmul.f32 2.0, %v2859_v8  ;;  %2860 = vtanh.f32 %v2002_v41  ;;  %v2005_v50 = vadd.f32 %v2004_v37, %v1908_v36  ;;  %v2010_v42 = vadd.f32 %v2606_v31, %v1913_v13 }
 0x33c   :  { %2364 = vst [vmem:[#allocation7 + $0x20] sm:$0xff] %v2344_v51   ;;  %v1916_v56 = vadd.f32 %v2559_v55, %v3352_v52 }
 0x33d   :  { %v2349_v45 = vpack.c.bf16 %v2043_v5, %v2042_v7  ;;  %2862 = vtanh.f32 %v2005_v50 }
 0x33e   :  { %2864 = vtanh.f32 %v2010_v42  ;;  %v2013_v19 = vadd.f32 %v2607_v44, %v1916_v56 }
 0x33f   :  { %2365 = vst [vmem:[#allocation7 + $0x28] sm:$0xff] %v2349_v45  }
 0x340   :  { %2866 = vtanh.f32 %v2013_v19 }
 0x345   :  { %v2861_v30 = vpop.eup %2860 }
 0x346   :  { %v2044_v48 = vmul.f32 2.0, %v2861_v30 }
 0x347   :  { %v2863_v38 = vpop.eup %2862 }
 0x348   :  { %v2865_v46 = vpop.eup %2864  ;;  %v2045_v47 = vmul.f32 2.0, %v2863_v38 }
 0x349   :  { %v2046_v54 = vmul.f32 2.0, %v2865_v46 }
 0x34a   :  { %v2867_v49 = vpop.eup %2866  ;;  %v2354_v53 = vpack.c.bf16 %v2045_v47, %v2044_v48 }
 0x34b   :  { %v2047_v57 = vmul.f32 2.0, %v2867_v49 }
 0x34c   :  { %2366 = vst [vmem:[#allocation7 + $0x30] sm:$0xff] %v2354_v53  }
 0x34d   :  { %v2359_v58 = vpack.c.bf16 %v2047_v57, %v2046_v54 }
 0x34f   :  { %2367 = vst [vmem:[#allocation7 + $0x38] sm:$0xff] %v2359_v58  }
 0x350   :  { %2923 = shalt.err (!%p2920_p6)
}
 0x351   :  { %s2924_s22 = scalar_lea.hbm %s3392_s7, 1024 }
 0x352   :  { %p2925_p7 = scmp.ne.s32.totalorder %s3392_s7, %s2924_s22  ;;  %p2928_p8 = scmp.lt.u32.totalorder %s2924_s22, %s3392_s7 }
 0x354   :  { %p2930_p9 = pnand %p2928_p8, %p2925_p7 }
 0x356   :  { %2933 = shalt.err (!%p2930_p9)
}
 0x357   :  { %2139 = dma.vmem_to_hbm [thread:$0]  %s2134_s18, 1024, %s3392_s7, [#allocation4], %s2944_s3, %s2944_s3, %s2945_s25  }
 0x358   :  { %2938 = dma.done.wait [#allocation4], 1024  }
 0x359   :  { %2939 = vsyncadd [#allocation4], 4294966272 }
 0x35a   :  { %2143 = vsyncpa [#allocation3], 1 }
 0x35b   :  { %2144 = vsyncpa [#allocation6], 1 }
 0x35c   :  { %2145 = vsyncpa [#allocation4], 1 }

</bundles_post_ra>
